<compile_context>
chip_gen: v7x
topology: tpu7x:2x2x1
jax: 0.10.0
libtpu: 0.0.40
codegen_flags: <defaults>
</compile_context>

<pallas_src>
import jax
import jax.numpy as jnp
from jax.experimental import pallas as pl
from jax.experimental.pallas import tpu as pltpu


ACT_DTYPE = jnp.bfloat16       # edge-stream storage dtype between layers
MXU_DTYPE = jnp.bfloat16       # matmul operand dtype (f32 accumulation)


# ----------------------------- small node MLP kernel -----------------------------

def _mlp2_kernel(x_ref, w1_ref, b1_ref, w2_ref, b2_ref, o_ref):
    h = jnp.dot(x_ref[...].astype(MXU_DTYPE), w1_ref[...].astype(MXU_DTYPE),
                preferred_element_type=jnp.float32)
    h = jnp.maximum(h + b1_ref[...].astype(jnp.float32), 0.0)
    o = jnp.dot(h.astype(MXU_DTYPE), w2_ref[...].astype(MXU_DTYPE),
                preferred_element_type=jnp.float32)
    o_ref[...] = (o + b2_ref[...].astype(jnp.float32)).astype(o_ref.dtype)


def mlp2(x, w1, b1, w2, b2, out_dtype=None, tile=1024):
    """Row-tiled Linear-ReLU-Linear; weights resident, rows software-pipelined."""
    M, din = x.shape
    dh = w1.shape[1]
    dout = w2.shape[1]
    out_dtype = out_dtype or x.dtype
    tm = min(M, tile)
    return pl.pallas_call(
        _mlp2_kernel,
        grid=(pl.cdiv(M, tm),),
        out_shape=jax.ShapeDtypeStruct((M, dout), out_dtype),
        in_specs=[pl.BlockSpec((tm, din), lambda i: (i, 0)),
                  pl.BlockSpec((din, dh), lambda i: (0, 0)),
                  pl.BlockSpec((1, dh), lambda i: (0, 0)),
                  pl.BlockSpec((dh, dout), lambda i: (0, 0)),
                  pl.BlockSpec((1, dout), lambda i: (0, 0))],
        out_specs=pl.BlockSpec((tm, dout), lambda i: (i, 0)),
        compiler_params=pltpu.CompilerParams(dimension_semantics=("parallel",)),
    )(x, w1, b1, w2, b2)


# ----------------------------- fused GNN layer kernel -----------------------------

def _make_gnn_kernel(fuse_in, fuse_out):
    """Kernel for one layer, tiled over (batch, source-node tile).

    Fuses: X = X + Y, optional linear_in_e (first layer), DenseLayer2 edge and
    node updates with skip connections, optional linear_out_e (last layer) and
    the node LayerNorm.
    """
    def kernel(x_ref, y_ref, a_ref, m_ref,
               wmi_ref, wmj_ref, wma_ref, bm_ref,
               wnx_ref, wna_ref, bn_ref,
               gamma_ref, beta_ref, *rest):
        k = 0
        if fuse_in:
            win_ref, bin_ref = rest[k], rest[k + 1]
            k += 2
        if fuse_out:
            wout_ref, bout_ref = rest[k], rest[k + 1]
            k += 2
        x_out_ref, a_out_ref = rest[k], rest[k + 1]

        TI, N, _ = a_ref.shape
        E = wma_ref.shape[0]
        row0 = pl.program_id(1) * TI
        if TI % 8 == 0:
            row0 = pl.multiple_of(row0, 8)

        y = y_ref[...].astype(jnp.float32)                          # (1, F)
        # Fused "X = X + Y" from the outer loop.
        X_all = x_ref[...].astype(jnp.float32) + y                  # (N, F)
        X_i = x_ref[pl.ds(row0, TI), :].astype(jnp.float32) + y     # (TI, F)
        m_all = m_ref[...].astype(jnp.float32)                      # (N, 1)
        m_i = m_ref[pl.ds(row0, TI), :].astype(jnp.float32)         # (TI, 1)
        pair_mask = m_i[:, None, :] * m_all[None, :, :]             # (TI, N, 1)

        # Edge base features.  First layer: linear_in_e fused here; otherwise
        # the bf16 ref feeds the MXU directly (no persistent f32 copy).
        if fuse_in:
            e_in = a_ref.shape[-1]
            a_base2d = (jnp.dot(
                a_ref[...].reshape(TI * N, e_in).astype(MXU_DTYPE),
                win_ref[...].astype(MXU_DTYPE),
                preferred_element_type=jnp.float32)
                + bin_ref[...].astype(jnp.float32))                 # (TI*N, E) f32
            ca_src = a_base2d.astype(MXU_DTYPE)
        else:
            ca_src = a_ref[...].reshape(TI * N, E)                  # bf16

        # Edge message: relu(W_i x_i + W_j x_j + W_a a_ij + b), masked.
        # (concat split into sums; bias folded into the x_i term.)
        ci = (jnp.dot(X_i.astype(MXU_DTYPE), wmi_ref[...].astype(MXU_DTYPE),
                      preferred_element_type=jnp.float32)
              + bm_ref[...].astype(jnp.float32))                    # (TI, E)
        cj = jnp.dot(X_all.astype(MXU_DTYPE), wmj_ref[...].astype(MXU_DTYPE),
                     preferred_element_type=jnp.float32)            # (N, E)
        ca = jnp.dot(ca_src, wma_ref[...].astype(MXU_DTYPE),
                     preferred_element_type=jnp.float32).reshape(TI, N, E)
        msg = jnp.maximum(ci[:, None, :] + cj[None, :, :] + ca, 0.0) * pair_mask

        # Node update: aggregate over neighbours j, MLP, skip, LayerNorm.
        agg = jnp.sum(msg, axis=1)                                  # (TI, E)
        upd = jnp.dot(X_i.astype(MXU_DTYPE), wnx_ref[...].astype(MXU_DTYPE),
                      preferred_element_type=jnp.float32)
        upd = upd + jnp.dot(agg.astype(MXU_DTYPE), wna_ref[...].astype(MXU_DTYPE),
                            preferred_element_type=jnp.float32)
        upd = jnp.maximum(upd + bn_ref[...].astype(jnp.float32), 0.0)
        xn = X_i + upd * m_i
        mu = jnp.mean(xn, axis=-1, keepdims=True)
        var = jnp.mean((xn - mu) ** 2, axis=-1, keepdims=True)
        xhat = (xn - mu) * jax.lax.rsqrt(var + 1e-5)
        x_out_ref[...] = (xhat * gamma_ref[...].astype(jnp.float32)
                          + beta_ref[...].astype(jnp.float32)).astype(x_out_ref.dtype)

        # Edge skip connection in a single pass at the store; for the last
        # layer linear_out_e is fused here as well.
        if fuse_in:
            a_new = a_base2d.reshape(TI, N, E) + msg
        else:
            a_new = a_ref[...].astype(jnp.float32) + msg
        if fuse_out:
            e_out = a_out_ref.shape[-1]
            a_proj = (jnp.dot(a_new.reshape(TI * N, E).astype(MXU_DTYPE),
                              wout_ref[...].astype(MXU_DTYPE),
                              preferred_element_type=jnp.float32)
                      + bout_ref[...].astype(jnp.float32))
            a_out_ref[...] = a_proj.reshape(TI, N, e_out).astype(a_out_ref.dtype)
        else:
            a_out_ref[...] = a_new.astype(a_out_ref.dtype)

    return kernel


# ----------------------------- tile sizing -----------------------------

def _vmem_budget():
    """(edge-tile byte budget, vmem_limit_bytes) sized from the chip's VMEM."""
    cap = None
    try:
        cap = getattr(pltpu.get_tpu_info(), "vmem_capacity_bytes", None)
    except Exception:
        cap = None
    if not cap:
        cap = 64 * 1024 * 1024              # conservative: v7x per-TC VMEM
    vmem_limit = int(cap * 3 // 4)          # ~48 MiB on v7x, ~96 MiB on v5e/v6e
    tile_budget = int(vmem_limit * 3 // 5)  # headroom for X/weights/temporaries
    return tile_budget, vmem_limit


def _pick_node_tile(n, e_in, in_itemsize, e_out, out_itemsize, budget):
    """Largest source-node tile TI whose *padded* VMEM footprint fits `budget`.

    Accounts for 128-lane padding of the edge feature dim, sublane padding of
    the neighbour dim, double buffering of both the A input and A output
    blocks, and two f32 (TI, N, E)-sized in-kernel temporaries.
    """
    def blk_row_bytes(e, itemsize):
        sub = 8 * (4 // itemsize) if itemsize < 4 else 8
        n_pad = -(-n // sub) * sub
        e_pad = -(-e // 128) * 128
        return n_pad * e_pad * itemsize

    e_big = max(e_in, e_out)
    per_ti = (2 * blk_row_bytes(e_in, in_itemsize)       # A in, double-buffered
              + 2 * blk_row_bytes(e_out, out_itemsize)   # A out, double-buffered
              + 2 * blk_row_bytes(e_big, 4))             # f32 msg + one live temp
    cands = ([t for t in range(16, n + 1, 16) if n % t == 0]
             or [t for t in range(8, n + 1, 8) if n % t == 0]
             or [n])
    fits = [t for t in cands if t * per_ti <= budget]
    return fits[-1] if fits else cands[0]


# ----------------------------- layer wrapper -----------------------------

def gnn_layer(X, Y, A, maskf, p, ln, *, in_proj=None, out_proj=None):
    """One fused layer: (X + Y) -> [linear_in_e] -> DenseLayer2(skip) ->
    [linear_out_e on A] -> node LayerNorm.  Grid tiles (batch, source node)."""
    B, N, F = X.shape
    e_in = A.shape[-1]
    ehf = p['wma'].shape[0]
    fuse_in = in_proj is not None
    fuse_out = out_proj is not None
    e_out = out_proj[0].shape[1] if fuse_out else ehf
    a_out_dtype = jnp.float32 if fuse_out else ACT_DTYPE

    budget, vmem_limit = _vmem_budget()
    TI = _pick_node_tile(N, e_in, jnp.dtype(A.dtype).itemsize,
                         e_out, jnp.dtype(a_out_dtype).itemsize, budget)
    grid = (B, N // TI)

    def const_spec(arr):
        nd = arr.ndim
        return pl.BlockSpec(arr.shape, lambda b, i, _nd=nd: (0,) * _nd)

    in_arrays = [X, Y, A, maskf,
                 p['wmi'], p['wmj'], p['wma'], p['bm'],
                 p['wnx'], p['wna'], p['bn'], ln[0], ln[1]]
    in_specs = [
        pl.BlockSpec((None, N, F), lambda b, i: (b, 0, 0)),            # X (all nodes)
        pl.BlockSpec((None, 1, F), lambda b, i: (b, 0, 0)),            # Y row
        pl.BlockSpec((None, TI, N, e_in), lambda b, i: (b, i, 0, 0)),  # A src tile
        pl.BlockSpec((None, N, 1), lambda b, i: (b, 0, 0)),            # mask
    ] + [const_spec(a) for a in in_arrays[4:]]
    if fuse_in:
        in_arrays += list(in_proj)
        in_specs += [const_spec(a) for a in in_proj]
    if fuse_out:
        in_arrays += list(out_proj)
        in_specs += [const_spec(a) for a in out_proj]

    X_out, A_out = pl.pallas_call(
        _make_gnn_kernel(fuse_in, fuse_out),
        grid=grid,
        out_shape=(jax.ShapeDtypeStruct((B, N, F), jnp.float32),
                   jax.ShapeDtypeStruct((B, N, N, e_out), a_out_dtype)),
        in_specs=in_specs,
        out_specs=(pl.BlockSpec((None, TI, F), lambda b, i: (b, i, 0)),
                   pl.BlockSpec((None, TI, N, e_out), lambda b, i: (b, i, 0, 0))),
        compiler_params=pltpu.CompilerParams(
            dimension_semantics=("parallel", "parallel"),
            vmem_limit_bytes=vmem_limit),
    )(*in_arrays)
    return X_out, A_out


# ----------------------------- model -----------------------------

def init_params(key, *, nnf_in, nef_in, nnf_out, nef_out, nhf, fact, n_layers):
    ehf = nhf // fact
    kit = iter(jax.random.split(key, 256))

    def W(din, dout):
        return (jax.random.normal(next(kit), (din, dout), jnp.float32)
                * (1.0 / (din ** 0.5)))

    def b(d):
        return jnp.zeros((1, d), jnp.float32)

    params = {
        'lin_in_x': (W(nnf_in, nhf), b(nhf), W(nhf, nhf), b(nhf)),
        'lin_in_e': (W(nef_in, ehf), b(ehf)),                # plain Linear (fused)
        'lin_out_x': (W(nhf, nhf), b(nhf), W(nhf, nnf_out), b(nnf_out)),
        'lin_out_e': (W(ehf, nef_out), b(nef_out)),          # plain Linear (fused)
        'layers': [],
    }
    for _ in range(n_layers):
        params['layers'].append({
            'y': (W(nhf, nhf), b(nhf), W(nhf, nhf), b(nhf)),
            'gnn': dict(wmi=W(nhf, ehf), wmj=W(nhf, ehf), wma=W(ehf, ehf), bm=b(ehf),
                        wnx=W(nhf, nhf), wna=W(ehf, nhf), bn=b(nhf)),
            'ln': (jnp.ones((1, nhf), jnp.float32), jnp.zeros((1, nhf), jnp.float32)),
        })
    return params


@jax.jit
def dense_gnn2_forward(params, X_in, A_in, mask):
    B, N, _ = X_in.shape
    nhf = params['lin_in_x'][0].shape[1]
    maskf = mask.astype(jnp.float32).reshape(B, N, 1)

    # X = linear_in_x(X_in)  (Linear-ReLU-Linear).  Node stream stays f32.
    X = mlp2(X_in.reshape(B * N, -1), *params['lin_in_x'],
             out_dtype=jnp.float32).reshape(B, N, nhf)

    # A = linear_in_e(A_in) is fused into the first GNN layer; between layers
    # the edge stream is stored bf16 (halves HBM traffic of the dominant tensor).
    A = A_in
    n_layers = len(params['layers'])
    for li, lyr in enumerate(params['layers']):
        # Y = ylayer(X.mean(dim=1, keepdim=True)); the "X = X + Y" add is fused
        # into the GNN kernel.  The mean is unmasked, exactly as in the reference.
        Y = mlp2(jnp.mean(X, axis=1), *lyr['y'],
                 out_dtype=jnp.float32).reshape(B, 1, nhf)
        X, A = gnn_layer(X, Y, A, maskf, lyr['gnn'], lyr['ln'],
                         in_proj=params['lin_in_e'] if li == 0 else None,
                         out_proj=params['lin_out_e'] if li == n_layers - 1 else None)
        # TODO(synk): X_new from nn.MultiheadAttention is unused in the
        # reference forward (result discarded) -> omitted.

    X = mlp2(X.reshape(B * N, nhf), *params['lin_out_x'],
             out_dtype=jnp.float32).reshape(B, N, -1)
    # linear_out_e(A) was fused into the last GNN layer's epilogue.  The
    # symmetrization needs the transposed (j, i) tile, which a single (b, i)
    # tile invocation never sees, so it is left to XLA on the small
    # nef_out-wide output (same op order as the reference: linear, then sym).
    A = (A + jnp.swapaxes(A, 1, 2)) * 0.5
    return X, A


# ----------------------------- demo -----------------------------

if __name__ == "__main__":
    # config: nhf=32, edge_node_ratio=2 (ehf=16), n_layers=2,
    #         normalization='layer_norm', norm_out=True.
    B, N = 2, 8
    nnf_in, nef_in = 4, 2
    nnf_out, nef_out = 4, 2
    nhf, fact, n_layers = 32, 2, 2

    key = jax.random.PRNGKey(0)
    kp, kx, ka = jax.random.split(key, 3)

    params = init_params(kp, nnf_in=nnf_in, nef_in=nef_in, nnf_out=nnf_out,
                         nef_out=nef_out, nhf=nhf, fact=fact, n_layers=n_layers)

    X_in = jax.random.normal(kx, (B, N, nnf_in), jnp.float32)
    A_in = jax.random.normal(ka, (B, N, N, nef_in), jnp.float32)
    lengths = jnp.array([N, N - 2], dtype=jnp.int32)
    mask = jnp.arange(N)[None, :] < lengths[:, None]       # (B, N) bool, True = valid

    X_out, A_out = dense_gnn2_forward(params, X_in, A_in, mask)
    jax.block_until_ready((X_out, A_out))

    assert X_out.shape == (B, N, nnf_out)
    assert A_out.shape == (B, N, N, nef_out)
    assert bool(jnp.all(jnp.isfinite(X_out))) and bool(jnp.all(jnp.isfinite(A_out)))
    # symmetry check on A
    assert bool(jnp.allclose(A_out, jnp.swapaxes(A_out, 1, 2), atol=1e-5))

    print("KERNEL_OK")
</pallas_src>

<mosaic_0001>
module attributes {stable_mosaic.version = 11 : i64} {
  func.func @_mlp2_kernel(%arg0: i32, %arg1: memref<16x4xf32, #tpu.memory_space<vmem>>, %arg2: memref<4x32xf32, #tpu.memory_space<vmem>>, %arg3: memref<1x32xf32, #tpu.memory_space<vmem>>, %arg4: memref<32x32xf32, #tpu.memory_space<vmem>>, %arg5: memref<1x32xf32, #tpu.memory_space<vmem>>, %arg6: memref<16x32xf32, #tpu.memory_space<vmem>>) attributes {dimension_semantics = [#tpu.dimension_semantics<parallel>], iteration_bounds = array<i64: 1>, scalar_prefetch = 0 : i64, scratch_operands = 0 : i64, tpu.core_type = #tpu.core_type<tc>, window_params = [{transform_indices = @transform_0, window_bounds = array<i64: 16, 4>}, {pipeline_mode = #tpu.pipeline_mode<synchronous>, transform_indices = @transform_1, window_bounds = array<i64: 4, 32>}, {pipeline_mode = #tpu.pipeline_mode<synchronous>, transform_indices = @transform_2, window_bounds = array<i64: 1, 32>}, {pipeline_mode = #tpu.pipeline_mode<synchronous>, transform_indices = @transform_3, window_bounds = array<i64: 32, 32>}, {pipeline_mode = #tpu.pipeline_mode<synchronous>, transform_indices = @transform_4, window_bounds = array<i64: 1, 32>}, {transform_indices = @transform_5, window_bounds = array<i64: 16, 32>}]} {
    %c0 = arith.constant 0 : index
    %c0_0 = arith.constant 0 : index
    %0 = vector.load %arg1[%c0, %c0_0] : memref<16x4xf32, #tpu.memory_space<vmem>>, vector<16x4xf32>
    %1 = arith.truncf %0 : vector<16x4xf32> to vector<16x4xbf16>
    %c0_1 = arith.constant 0 : index
    %c0_2 = arith.constant 0 : index
    %2 = vector.load %arg2[%c0_1, %c0_2] : memref<4x32xf32, #tpu.memory_space<vmem>>, vector<4x32xf32>
    %3 = arith.truncf %2 : vector<4x32xf32> to vector<4x32xbf16>
    %cst = arith.constant dense<0.000000e+00> : vector<16x32xf32>
    %4 = tpu.matmul %1, %3, %cst {dimension_numbers = #tpu.dot_dimension_numbers<[1], [0], [0], [1], [0, 0, 1, 1], [], []>} : vector<16x4xbf16>, vector<4x32xbf16>, vector<16x32xf32> -> vector<16x32xf32>
    %c0_3 = arith.constant 0 : index
    %c0_4 = arith.constant 0 : index
    %5 = vector.load %arg3[%c0_3, %c0_4] : memref<1x32xf32, #tpu.memory_space<vmem>>, vector<1x32xf32>
    %6 = vector.broadcast %5 : vector<1x32xf32> to vector<16x32xf32>
    %7 = arith.addf %4, %6 : vector<16x32xf32>
    %cst_5 = arith.constant 0.000000e+00 : f32
    %8 = vector.broadcast %cst_5 : f32 to vector<16x32xf32>
    %9 = arith.maximumf %7, %8 : vector<16x32xf32>
    %10 = arith.truncf %9 : vector<16x32xf32> to vector<16x32xbf16>
    %c0_6 = arith.constant 0 : index
    %c0_7 = arith.constant 0 : index
    %11 = vector.load %arg4[%c0_6, %c0_7] : memref<32x32xf32, #tpu.memory_space<vmem>>, vector<32x32xf32>
    %12 = arith.truncf %11 : vector<32x32xf32> to vector<32x32xbf16>
    %cst_8 = arith.constant dense<0.000000e+00> : vector<16x32xf32>
    %13 = tpu.matmul %10, %12, %cst_8 {dimension_numbers = #tpu.dot_dimension_numbers<[1], [0], [0], [1], [0, 0, 1, 1], [], []>} : vector<16x32xbf16>, vector<32x32xbf16>, vector<16x32xf32> -> vector<16x32xf32>
    %c0_9 = arith.constant 0 : index
    %c0_10 = arith.constant 0 : index
    %14 = vector.load %arg5[%c0_9, %c0_10] : memref<1x32xf32, #tpu.memory_space<vmem>>, vector<1x32xf32>
    %15 = vector.broadcast %14 : vector<1x32xf32> to vector<16x32xf32>
    %16 = arith.addf %13, %15 : vector<16x32xf32>
    %c0_11 = arith.constant 0 : index
    %c0_12 = arith.constant 0 : index
    %17 = vector.load %arg6[%c0_11, %c0_12] : memref<16x32xf32, #tpu.memory_space<vmem>>, vector<16x32xf32>
    tpu.vector_store %arg6[%c0_11, %c0_12], %16 {strides = array<i32>} : memref<16x32xf32, #tpu.memory_space<vmem>>, vector<16x32xf32>,
    return
  }
  func.func @transform_0(%arg0: i32) -> (i32, i32) {
    %c0_i32 = arith.constant 0 : i32
    %c0_i32_0 = arith.constant 0 : i32
    return %arg0, %c0_i32 : i32, i32
  }
  func.func @transform_1(%arg0: i32) -> (i32, i32) {
    %c0_i32 = arith.constant 0 : i32
    %c0_i32_0 = arith.constant 0 : i32
    %c0_i32_1 = arith.constant 0 : i32
    return %c0_i32, %c0_i32_0 : i32, i32
  }
  func.func @transform_2(%arg0: i32) -> (i32, i32) {
    %c0_i32 = arith.constant 0 : i32
    %c0_i32_0 = arith.constant 0 : i32
    %c0_i32_1 = arith.constant 0 : i32
    return %c0_i32, %c0_i32_0 : i32, i32
  }
  func.func @transform_3(%arg0: i32) -> (i32, i32) {
    %c0_i32 = arith.constant 0 : i32
    %c0_i32_0 = arith.constant 0 : i32
    %c0_i32_1 = arith.constant 0 : i32
    return %c0_i32, %c0_i32_0 : i32, i32
  }
  func.func @transform_4(%arg0: i32) -> (i32, i32) {
    %c0_i32 = arith.constant 0 : i32
    %c0_i32_0 = arith.constant 0 : i32
    %c0_i32_1 = arith.constant 0 : i32
    return %c0_i32, %c0_i32_0 : i32, i32
  }
  func.func @transform_5(%arg0: i32) -> (i32, i32) {
    %c0_i32 = arith.constant 0 : i32
    %c0_i32_0 = arith.constant 0 : i32
    return %arg0, %c0_i32 : i32, i32
  }
}

module attributes {stable_mosaic.version = 11 : i64} {
  func.func @_mlp2_kernel(%arg0: i32, %arg1: memref<2x32xf32, #tpu.memory_space<vmem>>, %arg2: memref<32x32xf32, #tpu.memory_space<vmem>>, %arg3: memref<1x32xf32, #tpu.memory_space<vmem>>, %arg4: memref<32x32xf32, #tpu.memory_space<vmem>>, %arg5: memref<1x32xf32, #tpu.memory_space<vmem>>, %arg6: memref<2x32xf32, #tpu.memory_space<vmem>>) attributes {dimension_semantics = [#tpu.dimension_semantics<parallel>], iteration_bounds = array<i64: 1>, scalar_prefetch = 0 : i64, scratch_operands = 0 : i64, tpu.core_type = #tpu.core_type<tc>, window_params = [{transform_indices = @transform_0, window_bounds = array<i64: 2, 32>}, {pipeline_mode = #tpu.pipeline_mode<synchronous>, transform_indices = @transform_1, window_bounds = array<i64: 32, 32>}, {pipeline_mode = #tpu.pipeline_mode<synchronous>, transform_indices = @transform_2, window_bounds = array<i64: 1, 32>}, {pipeline_mode = #tpu.pipeline_mode<synchronous>, transform_indices = @transform_3, window_bounds = array<i64: 32, 32>}, {pipeline_mode = #tpu.pipeline_mode<synchronous>, transform_indices = @transform_4, window_bounds = array<i64: 1, 32>}, {transform_indices = @transform_5, window_bounds = array<i64: 2, 32>}]} {
    %c0 = arith.constant 0 : index
    %c0_0 = arith.constant 0 : index
    %0 = vector.load %arg1[%c0, %c0_0] : memref<2x32xf32, #tpu.memory_space<vmem>>, vector<2x32xf32>
    %1 = arith.truncf %0 : vector<2x32xf32> to vector<2x32xbf16>
    %c0_1 = arith.constant 0 : index
    %c0_2 = arith.constant 0 : index
    %2 = vector.load %arg2[%c0_1, %c0_2] : memref<32x32xf32, #tpu.memory_space<vmem>>, vector<32x32xf32>
    %3 = arith.truncf %2 : vector<32x32xf32> to vector<32x32xbf16>
    %cst = arith.constant dense<0.000000e+00> : vector<2x32xf32>
    %4 = tpu.matmul %1, %3, %cst {dimension_numbers = #tpu.dot_dimension_numbers<[1], [0], [0], [1], [0, 0, 1, 1], [], []>} : vector<2x32xbf16>, vector<32x32xbf16>, vector<2x32xf32> -> vector<2x32xf32>
    %c0_3 = arith.constant 0 : index
    %c0_4 = arith.constant 0 : index
    %5 = vector.load %arg3[%c0_3, %c0_4] : memref<1x32xf32, #tpu.memory_space<vmem>>, vector<1x32xf32>
    %6 = vector.broadcast %5 : vector<1x32xf32> to vector<2x32xf32>
    %7 = arith.addf %4, %6 : vector<2x32xf32>
    %cst_5 = arith.constant 0.000000e+00 : f32
    %8 = vector.broadcast %cst_5 : f32 to vector<2x32xf32>
    %9 = arith.maximumf %7, %8 : vector<2x32xf32>
    %10 = arith.truncf %9 : vector<2x32xf32> to vector<2x32xbf16>
    %c0_6 = arith.constant 0 : index
    %c0_7 = arith.constant 0 : index
    %11 = vector.load %arg4[%c0_6, %c0_7] : memref<32x32xf32, #tpu.memory_space<vmem>>, vector<32x32xf32>
    %12 = arith.truncf %11 : vector<32x32xf32> to vector<32x32xbf16>
    %cst_8 = arith.constant dense<0.000000e+00> : vector<2x32xf32>
    %13 = tpu.matmul %10, %12, %cst_8 {dimension_numbers = #tpu.dot_dimension_numbers<[1], [0], [0], [1], [0, 0, 1, 1], [], []>} : vector<2x32xbf16>, vector<32x32xbf16>, vector<2x32xf32> -> vector<2x32xf32>
    %c0_9 = arith.constant 0 : index
    %c0_10 = arith.constant 0 : index
    %14 = vector.load %arg5[%c0_9, %c0_10] : memref<1x32xf32, #tpu.memory_space<vmem>>, vector<1x32xf32>
    %15 = vector.broadcast %14 : vector<1x32xf32> to vector<2x32xf32>
    %16 = arith.addf %13, %15 : vector<2x32xf32>
    %c0_11 = arith.constant 0 : index
    %c0_12 = arith.constant 0 : index
    %17 = vector.load %arg6[%c0_11, %c0_12] : memref<2x32xf32, #tpu.memory_space<vmem>>, vector<2x32xf32>
    tpu.vector_store %arg6[%c0_11, %c0_12], %16 {strides = array<i32>} : memref<2x32xf32, #tpu.memory_space<vmem>>, vector<2x32xf32>,
    return
  }
  func.func @transform_0(%arg0: i32) -> (i32, i32) {
    %c0_i32 = arith.constant 0 : i32
    %c0_i32_0 = arith.constant 0 : i32
    return %arg0, %c0_i32 : i32, i32
  }
  func.func @transform_1(%arg0: i32) -> (i32, i32) {
    %c0_i32 = arith.constant 0 : i32
    %c0_i32_0 = arith.constant 0 : i32
    %c0_i32_1 = arith.constant 0 : i32
    return %c0_i32, %c0_i32_0 : i32, i32
  }
  func.func @transform_2(%arg0: i32) -> (i32, i32) {
    %c0_i32 = arith.constant 0 : i32
    %c0_i32_0 = arith.constant 0 : i32
    %c0_i32_1 = arith.constant 0 : i32
    return %c0_i32, %c0_i32_0 : i32, i32
  }
  func.func @transform_3(%arg0: i32) -> (i32, i32) {
    %c0_i32 = arith.constant 0 : i32
    %c0_i32_0 = arith.constant 0 : i32
    %c0_i32_1 = arith.constant 0 : i32
    return %c0_i32, %c0_i32_0 : i32, i32
  }
  func.func @transform_4(%arg0: i32) -> (i32, i32) {
    %c0_i32 = arith.constant 0 : i32
    %c0_i32_0 = arith.constant 0 : i32
    %c0_i32_1 = arith.constant 0 : i32
    return %c0_i32, %c0_i32_0 : i32, i32
  }
  func.func @transform_5(%arg0: i32) -> (i32, i32) {
    %c0_i32 = arith.constant 0 : i32
    %c0_i32_0 = arith.constant 0 : i32
    return %arg0, %c0_i32 : i32, i32
  }
}

module attributes {stable_mosaic.version = 11 : i64} {
  func.func @kernel(%arg0: i32, %arg1: i32, %arg2: memref<1x8x32xf32, #tpu.memory_space<vmem>>, %arg3: memref<1x1x32xf32, #tpu.memory_space<vmem>>, %arg4: memref<1x8x8x2xf32, #tpu.memory_space<vmem>>, %arg5: memref<1x8x1xf32, #tpu.memory_space<vmem>>, %arg6: memref<32x16xf32, #tpu.memory_space<vmem>>, %arg7: memref<32x16xf32, #tpu.memory_space<vmem>>, %arg8: memref<16x16xf32, #tpu.memory_space<vmem>>, %arg9: memref<1x16xf32, #tpu.memory_space<vmem>>, %arg10: memref<32x32xf32, #tpu.memory_space<vmem>>, %arg11: memref<16x32xf32, #tpu.memory_space<vmem>>, %arg12: memref<1x32xf32, #tpu.memory_space<vmem>>, %arg13: memref<1x32xf32, #tpu.memory_space<vmem>>, %arg14: memref<1x32xf32, #tpu.memory_space<vmem>>, %arg15: memref<2x16xf32, #tpu.memory_space<vmem>>, %arg16: memref<1x16xf32, #tpu.memory_space<vmem>>, %arg17: memref<1x8x32xf32, #tpu.memory_space<vmem>>, %arg18: memref<1x8x8x16xbf16, #tpu.memory_space<vmem>>) attributes {dimension_semantics = [#tpu.dimension_semantics<parallel>, #tpu.dimension_semantics<parallel>], iteration_bounds = array<i64: 2, 1>, scalar_prefetch = 0 : i64, scratch_operands = 0 : i64, tpu.core_type = #tpu.core_type<tc>, window_params = [{transform_indices = @transform_0, window_bounds = array<i64: 1, 8, 32>}, {transform_indices = @transform_1, window_bounds = array<i64: 1, 1, 32>}, {transform_indices = @transform_2, window_bounds = array<i64: 1, 8, 8, 2>}, {transform_indices = @transform_3, window_bounds = array<i64: 1, 8, 1>}, {pipeline_mode = #tpu.pipeline_mode<synchronous>, transform_indices = @transform_4, window_bounds = array<i64: 32, 16>}, {pipeline_mode = #tpu.pipeline_mode<synchronous>, transform_indices = @transform_5, window_bounds = array<i64: 32, 16>}, {pipeline_mode = #tpu.pipeline_mode<synchronous>, transform_indices = @transform_6, window_bounds = array<i64: 16, 16>}, {pipeline_mode = #tpu.pipeline_mode<synchronous>, transform_indices = @transform_7, window_bounds = array<i64: 1, 16>}, {pipeline_mode = #tpu.pipeline_mode<synchronous>, transform_indices = @transform_8, window_bounds = array<i64: 32, 32>}, {pipeline_mode = #tpu.pipeline_mode<synchronous>, transform_indices = @transform_9, window_bounds = array<i64: 16, 32>}, {pipeline_mode = #tpu.pipeline_mode<synchronous>, transform_indices = @transform_10, window_bounds = array<i64: 1, 32>}, {pipeline_mode = #tpu.pipeline_mode<synchronous>, transform_indices = @transform_11, window_bounds = array<i64: 1, 32>}, {pipeline_mode = #tpu.pipeline_mode<synchronous>, transform_indices = @transform_12, window_bounds = array<i64: 1, 32>}, {pipeline_mode = #tpu.pipeline_mode<synchronous>, transform_indices = @transform_13, window_bounds = array<i64: 2, 16>}, {pipeline_mode = #tpu.pipeline_mode<synchronous>, transform_indices = @transform_14, window_bounds = array<i64: 1, 16>}, {transform_indices = @transform_15, window_bounds = array<i64: 1, 8, 32>}, {transform_indices = @transform_16, window_bounds = array<i64: 1, 8, 8, 16>}]} {
    %c8_i32 = arith.constant 8 : i32
    %0 = arith.muli %arg1, %c8_i32 : i32
    %1 = tpu.assume_multiple %0, 8 : i32
    %c0 = arith.constant 0 : index
    %c0_0 = arith.constant 0 : index
    %c0_1 = arith.constant 0 : index
    %2 = vector.load %arg3[%c0, %c0_0, %c0_1] : memref<1x1x32xf32, #tpu.memory_space<vmem>>, vector<1x1x32xf32>
    %3 = vector.shape_cast %2 : vector<1x1x32xf32> to vector<1x32xf32>
    %c0_2 = arith.constant 0 : index
    %c0_3 = arith.constant 0 : index
    %c0_4 = arith.constant 0 : index
    %4 = vector.load %arg2[%c0_2, %c0_3, %c0_4] : memref<1x8x32xf32, #tpu.memory_space<vmem>>, vector<1x8x32xf32>
    %5 = vector.shape_cast %4 : vector<1x8x32xf32> to vector<8x32xf32>
    %6 = vector.broadcast %3 : vector<1x32xf32> to vector<8x32xf32>
    %7 = arith.addf %5, %6 : vector<8x32xf32>
    %c0_5 = arith.constant 0 : index
    %8 = arith.index_cast %1 : i32 to index
    %c0_6 = arith.constant 0 : index
    %9 = vector.load %arg2[%c0_5, %8, %c0_6] : memref<1x8x32xf32, #tpu.memory_space<vmem>>, vector<1x8x32xf32>
    %10 = vector.shape_cast %9 : vector<1x8x32xf32> to vector<8x32xf32>
    %11 = vector.broadcast %3 : vector<1x32xf32> to vector<8x32xf32>
    %12 = arith.addf %10, %11 : vector<8x32xf32>
    %c0_7 = arith.constant 0 : index
    %c0_8 = arith.constant 0 : index
    %c0_9 = arith.constant 0 : index
    %13 = vector.load %arg5[%c0_7, %c0_8, %c0_9] : memref<1x8x1xf32, #tpu.memory_space<vmem>>, vector<1x8x1xf32>
    %14 = vector.shape_cast %13 : vector<1x8x1xf32> to vector<8x1xf32>
    %c0_10 = arith.constant 0 : index
    %15 = arith.index_cast %1 : i32 to index
    %c0_11 = arith.constant 0 : index
    %16 = vector.load %arg5[%c0_10, %15, %c0_11] : memref<1x8x1xf32, #tpu.memory_space<vmem>>, vector<1x8x1xf32>
    %17 = vector.shape_cast %16 : vector<1x8x1xf32> to vector<8x1xf32>
    %18 = vector.shape_cast %17 : vector<8x1xf32> to vector<8x1x1xf32>
    %19 = vector.shape_cast %14 : vector<8x1xf32> to vector<1x8x1xf32>
    %20 = vector.broadcast %18 : vector<8x1x1xf32> to vector<8x8x1xf32>
    %21 = vector.broadcast %19 : vector<1x8x1xf32> to vector<8x8x1xf32>
    %22 = arith.mulf %20, %21 : vector<8x8x1xf32>
    %c0_12 = arith.constant 0 : index
    %c0_13 = arith.constant 0 : index
    %c0_14 = arith.constant 0 : index
    %c0_15 = arith.constant 0 : index
    %23 = vector.load %arg4[%c0_12, %c0_13, %c0_14, %c0_15] : memref<1x8x8x2xf32, #tpu.memory_space<vmem>>, vector<1x8x8x2xf32>
    %24 = vector.shape_cast %23 : vector<1x8x8x2xf32> to vector<8x8x2xf32>
    %25 = vector.shape_cast %24 : vector<8x8x2xf32> to vector<64x2xf32>
    %26 = arith.truncf %25 : vector<64x2xf32> to vector<64x2xbf16>
    %c0_16 = arith.constant 0 : index
    %c0_17 = arith.constant 0 : index
    %27 = vector.load %arg15[%c0_16, %c0_17] : memref<2x16xf32, #tpu.memory_space<vmem>>, vector<2x16xf32>
    %28 = arith.truncf %27 : vector<2x16xf32> to vector<2x16xbf16>
    %cst = arith.constant dense<0.000000e+00> : vector<64x16xf32>
    %29 = tpu.matmul %26, %28, %cst {dimension_numbers = #tpu.dot_dimension_numbers<[1], [0], [0], [1], [0, 0, 1, 1], [], []>} : vector<64x2xbf16>, vector<2x16xbf16>, vector<64x16xf32> -> vector<64x16xf32>
    %c0_18 = arith.constant 0 : index
    %c0_19 = arith.constant 0 : index
    %30 = vector.load %arg16[%c0_18, %c0_19] : memref<1x16xf32, #tpu.memory_space<vmem>>, vector<1x16xf32>
    %31 = vector.broadcast %30 : vector<1x16xf32> to vector<64x16xf32>
    %32 = arith.addf %29, %31 : vector<64x16xf32>
    %33 = arith.truncf %32 : vector<64x16xf32> to vector<64x16xbf16>
    %34 = arith.truncf %12 : vector<8x32xf32> to vector<8x32xbf16>
    %c0_20 = arith.constant 0 : index
    %c0_21 = arith.constant 0 : index
    %35 = vector.load %arg6[%c0_20, %c0_21] : memref<32x16xf32, #tpu.memory_space<vmem>>, vector<32x16xf32>
    %36 = arith.truncf %35 : vector<32x16xf32> to vector<32x16xbf16>
    %cst_22 = arith.constant dense<0.000000e+00> : vector<8x16xf32>
    %37 = tpu.matmul %34, %36, %cst_22 {dimension_numbers = #tpu.dot_dimension_numbers<[1], [0], [0], [1], [0, 0, 1, 1], [], []>} : vector<8x32xbf16>, vector<32x16xbf16>, vector<8x16xf32> -> vector<8x16xf32>
    %c0_23 = arith.constant 0 : index
    %c0_24 = arith.constant 0 : index
    %38 = vector.load %arg9[%c0_23, %c0_24] : memref<1x16xf32, #tpu.memory_space<vmem>>, vector<1x16xf32>
    %39 = vector.broadcast %38 : vector<1x16xf32> to vector<8x16xf32>
    %40 = arith.addf %37, %39 : vector<8x16xf32>
    %41 = arith.truncf %7 : vector<8x32xf32> to vector<8x32xbf16>
    %c0_25 = arith.constant 0 : index
    %c0_26 = arith.constant 0 : index
    %42 = vector.load %arg7[%c0_25, %c0_26] : memref<32x16xf32, #tpu.memory_space<vmem>>, vector<32x16xf32>
    %43 = arith.truncf %42 : vector<32x16xf32> to vector<32x16xbf16>
    %cst_27 = arith.constant dense<0.000000e+00> : vector<8x16xf32>
    %44 = tpu.matmul %41, %43, %cst_27 {dimension_numbers = #tpu.dot_dimension_numbers<[1], [0], [0], [1], [0, 0, 1, 1], [], []>} : vector<8x32xbf16>, vector<32x16xbf16>, vector<8x16xf32> -> vector<8x16xf32>
    %c0_28 = arith.constant 0 : index
    %c0_29 = arith.constant 0 : index
    %45 = vector.load %arg8[%c0_28, %c0_29] : memref<16x16xf32, #tpu.memory_space<vmem>>, vector<16x16xf32>
    %46 = arith.truncf %45 : vector<16x16xf32> to vector<16x16xbf16>
    %cst_30 = arith.constant dense<0.000000e+00> : vector<64x16xf32>
    %47 = tpu.matmul %33, %46, %cst_30 {dimension_numbers = #tpu.dot_dimension_numbers<[1], [0], [0], [1], [0, 0, 1, 1], [], []>} : vector<64x16xbf16>, vector<16x16xbf16>, vector<64x16xf32> -> vector<64x16xf32>
    %48 = vector.shape_cast %47 : vector<64x16xf32> to vector<8x8x16xf32>
    %49 = vector.shape_cast %40 : vector<8x16xf32> to vector<8x1x16xf32>
    %50 = vector.shape_cast %44 : vector<8x16xf32> to vector<1x8x16xf32>
    %51 = vector.broadcast %49 : vector<8x1x16xf32> to vector<8x8x16xf32>
    %52 = vector.broadcast %50 : vector<1x8x16xf32> to vector<8x8x16xf32>
    %53 = arith.addf %51, %52 : vector<8x8x16xf32>
    %54 = arith.addf %53, %48 : vector<8x8x16xf32>
    %cst_31 = arith.constant 0.000000e+00 : f32
    %55 = vector.broadcast %cst_31 : f32 to vector<8x8x16xf32>
    %56 = arith.maximumf %54, %55 : vector<8x8x16xf32>
    %57 = vector.broadcast %22 : vector<8x8x1xf32> to vector<8x8x16xf32>
    %58 = arith.mulf %56, %57 : vector<8x8x16xf32>
    %cst_32 = arith.constant dense<0.000000e+00> : vector<8x16xf32>
    %59 = vector.multi_reduction <add>, %58, %cst_32 [1] : vector<8x8x16xf32> to vector<8x16xf32>
    %60 = arith.truncf %12 : vector<8x32xf32> to vector<8x32xbf16>
    %c0_33 = arith.constant 0 : index
    %c0_34 = arith.constant 0 : index
    %61 = vector.load %arg10[%c0_33, %c0_34] : memref<32x32xf32, #tpu.memory_space<vmem>>, vector<32x32xf32>
    %62 = arith.truncf %61 : vector<32x32xf32> to vector<32x32xbf16>
    %cst_35 = arith.constant dense<0.000000e+00> : vector<8x32xf32>
    %63 = tpu.matmul %60, %62, %cst_35 {dimension_numbers = #tpu.dot_dimension_numbers<[1], [0], [0], [1], [0, 0, 1, 1], [], []>} : vector<8x32xbf16>, vector<32x32xbf16>, vector<8x32xf32> -> vector<8x32xf32>
    %64 = arith.truncf %59 : vector<8x16xf32> to vector<8x16xbf16>
    %c0_36 = arith.constant 0 : index
    %c0_37 = arith.constant 0 : index
    %65 = vector.load %arg11[%c0_36, %c0_37] : memref<16x32xf32, #tpu.memory_space<vmem>>, vector<16x32xf32>
    %66 = arith.truncf %65 : vector<16x32xf32> to vector<16x32xbf16>
    %cst_38 = arith.constant dense<0.000000e+00> : vector<8x32xf32>
    %67 = tpu.matmul %64, %66, %cst_38 {dimension_numbers = #tpu.dot_dimension_numbers<[1], [0], [0], [1], [0, 0, 1, 1], [], []>} : vector<8x16xbf16>, vector<16x32xbf16>, vector<8x32xf32> -> vector<8x32xf32>
    %68 = arith.addf %63, %67 : vector<8x32xf32>
    %c0_39 = arith.constant 0 : index
    %c0_40 = arith.constant 0 : index
    %69 = vector.load %arg12[%c0_39, %c0_40] : memref<1x32xf32, #tpu.memory_space<vmem>>, vector<1x32xf32>
    %70 = vector.broadcast %69 : vector<1x32xf32> to vector<8x32xf32>
    %71 = arith.addf %68, %70 : vector<8x32xf32>
    %cst_41 = arith.constant 0.000000e+00 : f32
    %72 = vector.broadcast %cst_41 : f32 to vector<8x32xf32>
    %73 = arith.maximumf %71, %72 : vector<8x32xf32>
    %74 = vector.broadcast %17 : vector<8x1xf32> to vector<8x32xf32>
    %75 = arith.mulf %73, %74 : vector<8x32xf32>
    %76 = arith.addf %12, %75 : vector<8x32xf32>
    %cst_42 = arith.constant dense<0.000000e+00> : vector<8xf32>
    %77 = vector.multi_reduction <add>, %76, %cst_42 [1] : vector<8x32xf32> to vector<8xf32>
    %78 = vector.shape_cast %77 : vector<8xf32> to vector<8x1xf32>
    %cst_43 = arith.constant 3.200000e+01 : f32
    %79 = vector.broadcast %cst_43 : f32 to vector<8x1xf32>
    %80 = arith.divf %78, %79 : vector<8x1xf32>
    %81 = vector.broadcast %80 : vector<8x1xf32> to vector<8x32xf32>
    %82 = arith.subf %76, %81 : vector<8x32xf32>
    %83 = arith.mulf %82, %82 : vector<8x32xf32>
    %cst_44 = arith.constant dense<0.000000e+00> : vector<8xf32>
    %84 = vector.multi_reduction <add>, %83, %cst_44 [1] : vector<8x32xf32> to vector<8xf32>
    %85 = vector.shape_cast %84 : vector<8xf32> to vector<8x1xf32>
    %cst_45 = arith.constant 3.200000e+01 : f32
    %86 = vector.broadcast %cst_45 : f32 to vector<8x1xf32>
    %87 = arith.divf %85, %86 : vector<8x1xf32>
    %88 = vector.broadcast %80 : vector<8x1xf32> to vector<8x32xf32>
    %89 = arith.subf %76, %88 : vector<8x32xf32>
    %cst_46 = arith.constant 9.99999974E-6 : f32
    %90 = vector.broadcast %cst_46 : f32 to vector<8x1xf32>
    %91 = arith.addf %87, %90 : vector<8x1xf32>
    %92 = math.rsqrt %91 : vector<8x1xf32>
    %93 = vector.broadcast %92 : vector<8x1xf32> to vector<8x32xf32>
    %94 = arith.mulf %89, %93 : vector<8x32xf32>
    %c0_47 = arith.constant 0 : index
    %c0_48 = arith.constant 0 : index
    %95 = vector.load %arg13[%c0_47, %c0_48] : memref<1x32xf32, #tpu.memory_space<vmem>>, vector<1x32xf32>
    %96 = vector.broadcast %95 : vector<1x32xf32> to vector<8x32xf32>
    %97 = arith.mulf %94, %96 : vector<8x32xf32>
    %c0_49 = arith.constant 0 : index
    %c0_50 = arith.constant 0 : index
    %98 = vector.load %arg14[%c0_49, %c0_50] : memref<1x32xf32, #tpu.memory_space<vmem>>, vector<1x32xf32>
    %99 = vector.broadcast %98 : vector<1x32xf32> to vector<8x32xf32>
    %100 = arith.addf %97, %99 : vector<8x32xf32>
    %c0_51 = arith.constant 0 : index
    %c0_52 = arith.constant 0 : index
    %c0_53 = arith.constant 0 : index
    %101 = vector.load %arg17[%c0_51, %c0_52, %c0_53] : memref<1x8x32xf32, #tpu.memory_space<vmem>>, vector<1x8x32xf32>
    %102 = vector.shape_cast %101 : vector<1x8x32xf32> to vector<8x32xf32>
    %103 = vector.shape_cast %100 : vector<8x32xf32> to vector<1x8x32xf32>
    tpu.vector_store %arg17[%c0_51, %c0_52, %c0_53], %103 {strides = array<i32>} : memref<1x8x32xf32, #tpu.memory_space<vmem>>, vector<1x8x32xf32>,
    %104 = vector.shape_cast %32 : vector<64x16xf32> to vector<8x8x16xf32>
    %105 = arith.addf %104, %58 : vector<8x8x16xf32>
    %106 = arith.truncf %105 : vector<8x8x16xf32> to vector<8x8x16xbf16>
    %c0_54 = arith.constant 0 : index
    %c0_55 = arith.constant 0 : index
    %c0_56 = arith.constant 0 : index
    %c0_57 = arith.constant 0 : index
    %107 = vector.load %arg18[%c0_54, %c0_55, %c0_56, %c0_57] : memref<1x8x8x16xbf16, #tpu.memory_space<vmem>>, vector<1x8x8x16xbf16>
    %108 = vector.shape_cast %107 : vector<1x8x8x16xbf16> to vector<8x8x16xbf16>
    %109 = vector.shape_cast %106 : vector<8x8x16xbf16> to vector<1x8x8x16xbf16>
    tpu.vector_store %arg18[%c0_54, %c0_55, %c0_56, %c0_57], %109 {strides = array<i32>} : memref<1x8x8x16xbf16, #tpu.memory_space<vmem>>, vector<1x8x8x16xbf16>,
    return
  }
  func.func @transform_0(%arg0: i32, %arg1: i32) -> (i32, i32, i32) {
    %c0_i32 = arith.constant 0 : i32
    %c0_i32_0 = arith.constant 0 : i32
    %c0_i32_1 = arith.constant 0 : i32
    return %arg0, %c0_i32, %c0_i32_0 : i32, i32, i32
  }
  func.func @transform_1(%arg0: i32, %arg1: i32) -> (i32, i32, i32) {
    %c0_i32 = arith.constant 0 : i32
    %c0_i32_0 = arith.constant 0 : i32
    %c0_i32_1 = arith.constant 0 : i32
    return %arg0, %c0_i32, %c0_i32_0 : i32, i32, i32
  }
  func.func @transform_2(%arg0: i32, %arg1: i32) -> (i32, i32, i32, i32) {
    %c0_i32 = arith.constant 0 : i32
    %c0_i32_0 = arith.constant 0 : i32
    %c0_i32_1 = arith.constant 0 : i32
    return %arg0, %arg1, %c0_i32, %c0_i32_0 : i32, i32, i32, i32
  }
  func.func @transform_3(%arg0: i32, %arg1: i32) -> (i32, i32, i32) {
    %c0_i32 = arith.constant 0 : i32
    %c0_i32_0 = arith.constant 0 : i32
    %c0_i32_1 = arith.constant 0 : i32
    return %arg0, %c0_i32, %c0_i32_0 : i32, i32, i32
  }
  func.func @transform_4(%arg0: i32, %arg1: i32) -> (i32, i32) {
    %c0_i32 = arith.constant 0 : i32
    %c0_i32_0 = arith.constant 0 : i32
    %c0_i32_1 = arith.constant 0 : i32
    return %c0_i32, %c0_i32_0 : i32, i32
  }
  func.func @transform_5(%arg0: i32, %arg1: i32) -> (i32, i32) {
    %c0_i32 = arith.constant 0 : i32
    %c0_i32_0 = arith.constant 0 : i32
    %c0_i32_1 = arith.constant 0 : i32
    return %c0_i32, %c0_i32_0 : i32, i32
  }
  func.func @transform_6(%arg0: i32, %arg1: i32) -> (i32, i32) {
    %c0_i32 = arith.constant 0 : i32
    %c0_i32_0 = arith.constant 0 : i32
    %c0_i32_1 = arith.constant 0 : i32
    return %c0_i32, %c0_i32_0 : i32, i32
  }
  func.func @transform_7(%arg0: i32, %arg1: i32) -> (i32, i32) {
    %c0_i32 = arith.constant 0 : i32
    %c0_i32_0 = arith.constant 0 : i32
    %c0_i32_1 = arith.constant 0 : i32
    return %c0_i32, %c0_i32_0 : i32, i32
  }
  func.func @transform_8(%arg0: i32, %arg1: i32) -> (i32, i32) {
    %c0_i32 = arith.constant 0 : i32
    %c0_i32_0 = arith.constant 0 : i32
    %c0_i32_1 = arith.constant 0 : i32
    return %c0_i32, %c0_i32_0 : i32, i32
  }
  func.func @transform_9(%arg0: i32, %arg1: i32) -> (i32, i32) {
    %c0_i32 = arith.constant 0 : i32
    %c0_i32_0 = arith.constant 0 : i32
    %c0_i32_1 = arith.constant 0 : i32
    return %c0_i32, %c0_i32_0 : i32, i32
  }
  func.func @transform_10(%arg0: i32, %arg1: i32) -> (i32, i32) {
    %c0_i32 = arith.constant 0 : i32
    %c0_i32_0 = arith.constant 0 : i32
    %c0_i32_1 = arith.constant 0 : i32
    return %c0_i32, %c0_i32_0 : i32, i32
  }
  func.func @transform_11(%arg0: i32, %arg1: i32) -> (i32, i32) {
    %c0_i32 = arith.constant 0 : i32
    %c0_i32_0 = arith.constant 0 : i32
    %c0_i32_1 = arith.constant 0 : i32
    return %c0_i32, %c0_i32_0 : i32, i32
  }
  func.func @transform_12(%arg0: i32, %arg1: i32) -> (i32, i32) {
    %c0_i32 = arith.constant 0 : i32
    %c0_i32_0 = arith.constant 0 : i32
    %c0_i32_1 = arith.constant 0 : i32
    return %c0_i32, %c0_i32_0 : i32, i32
  }
  func.func @transform_13(%arg0: i32, %arg1: i32) -> (i32, i32) {
    %c0_i32 = arith.constant 0 : i32
    %c0_i32_0 = arith.constant 0 : i32
    %c0_i32_1 = arith.constant 0 : i32
    return %c0_i32, %c0_i32_0 : i32, i32
  }
  func.func @transform_14(%arg0: i32, %arg1: i32) -> (i32, i32) {
    %c0_i32 = arith.constant 0 : i32
    %c0_i32_0 = arith.constant 0 : i32
    %c0_i32_1 = arith.constant 0 : i32
    return %c0_i32, %c0_i32_0 : i32, i32
  }
  func.func @transform_15(%arg0: i32, %arg1: i32) -> (i32, i32, i32) {
    %c0_i32 = arith.constant 0 : i32
    %c0_i32_0 = arith.constant 0 : i32
    return %arg0, %arg1, %c0_i32 : i32, i32, i32
  }
  func.func @transform_16(%arg0: i32, %arg1: i32) -> (i32, i32, i32, i32) {
    %c0_i32 = arith.constant 0 : i32
    %c0_i32_0 = arith.constant 0 : i32
    %c0_i32_1 = arith.constant 0 : i32
    return %arg0, %arg1, %c0_i32, %c0_i32_0 : i32, i32, i32, i32
  }
}

module attributes {stable_mosaic.version = 11 : i64} {
  func.func @kernel(%arg0: i32, %arg1: i32, %arg2: memref<1x8x32xf32, #tpu.memory_space<vmem>>, %arg3: memref<1x1x32xf32, #tpu.memory_space<vmem>>, %arg4: memref<1x8x8x16xbf16, #tpu.memory_space<vmem>>, %arg5: memref<1x8x1xf32, #tpu.memory_space<vmem>>, %arg6: memref<32x16xf32, #tpu.memory_space<vmem>>, %arg7: memref<32x16xf32, #tpu.memory_space<vmem>>, %arg8: memref<16x16xf32, #tpu.memory_space<vmem>>, %arg9: memref<1x16xf32, #tpu.memory_space<vmem>>, %arg10: memref<32x32xf32, #tpu.memory_space<vmem>>, %arg11: memref<16x32xf32, #tpu.memory_space<vmem>>, %arg12: memref<1x32xf32, #tpu.memory_space<vmem>>, %arg13: memref<1x32xf32, #tpu.memory_space<vmem>>, %arg14: memref<1x32xf32, #tpu.memory_space<vmem>>, %arg15: memref<16x2xf32, #tpu.memory_space<vmem>>, %arg16: memref<1x2xf32, #tpu.memory_space<vmem>>, %arg17: memref<1x8x32xf32, #tpu.memory_space<vmem>>, %arg18: memref<1x8x8x2xf32, #tpu.memory_space<vmem>>) attributes {dimension_semantics = [#tpu.dimension_semantics<parallel>, #tpu.dimension_semantics<parallel>], iteration_bounds = array<i64: 2, 1>, scalar_prefetch = 0 : i64, scratch_operands = 0 : i64, tpu.core_type = #tpu.core_type<tc>, window_params = [{transform_indices = @transform_0, window_bounds = array<i64: 1, 8, 32>}, {transform_indices = @transform_1, window_bounds = array<i64: 1, 1, 32>}, {transform_indices = @transform_2, window_bounds = array<i64: 1, 8, 8, 16>}, {transform_indices = @transform_3, window_bounds = array<i64: 1, 8, 1>}, {pipeline_mode = #tpu.pipeline_mode<synchronous>, transform_indices = @transform_4, window_bounds = array<i64: 32, 16>}, {pipeline_mode = #tpu.pipeline_mode<synchronous>, transform_indices = @transform_5, window_bounds = array<i64: 32, 16>}, {pipeline_mode = #tpu.pipeline_mode<synchronous>, transform_indices = @transform_6, window_bounds = array<i64: 16, 16>}, {pipeline_mode = #tpu.pipeline_mode<synchronous>, transform_indices = @transform_7, window_bounds = array<i64: 1, 16>}, {pipeline_mode = #tpu.pipeline_mode<synchronous>, transform_indices = @transform_8, window_bounds = array<i64: 32, 32>}, {pipeline_mode = #tpu.pipeline_mode<synchronous>, transform_indices = @transform_9, window_bounds = array<i64: 16, 32>}, {pipeline_mode = #tpu.pipeline_mode<synchronous>, transform_indices = @transform_10, window_bounds = array<i64: 1, 32>}, {pipeline_mode = #tpu.pipeline_mode<synchronous>, transform_indices = @transform_11, window_bounds = array<i64: 1, 32>}, {pipeline_mode = #tpu.pipeline_mode<synchronous>, transform_indices = @transform_12, window_bounds = array<i64: 1, 32>}, {pipeline_mode = #tpu.pipeline_mode<synchronous>, transform_indices = @transform_13, window_bounds = array<i64: 16, 2>}, {pipeline_mode = #tpu.pipeline_mode<synchronous>, transform_indices = @transform_14, window_bounds = array<i64: 1, 2>}, {transform_indices = @transform_15, window_bounds = array<i64: 1, 8, 32>}, {transform_indices = @transform_16, window_bounds = array<i64: 1, 8, 8, 2>}]} {
    %c8_i32 = arith.constant 8 : i32
    %0 = arith.muli %arg1, %c8_i32 : i32
    %1 = tpu.assume_multiple %0, 8 : i32
    %c0 = arith.constant 0 : index
    %c0_0 = arith.constant 0 : index
    %c0_1 = arith.constant 0 : index
    %2 = vector.load %arg3[%c0, %c0_0, %c0_1] : memref<1x1x32xf32, #tpu.memory_space<vmem>>, vector<1x1x32xf32>
    %3 = vector.shape_cast %2 : vector<1x1x32xf32> to vector<1x32xf32>
    %c0_2 = arith.constant 0 : index
    %c0_3 = arith.constant 0 : index
    %c0_4 = arith.constant 0 : index
    %4 = vector.load %arg2[%c0_2, %c0_3, %c0_4] : memref<1x8x32xf32, #tpu.memory_space<vmem>>, vector<1x8x32xf32>
    %5 = vector.shape_cast %4 : vector<1x8x32xf32> to vector<8x32xf32>
    %6 = vector.broadcast %3 : vector<1x32xf32> to vector<8x32xf32>
    %7 = arith.addf %5, %6 : vector<8x32xf32>
    %c0_5 = arith.constant 0 : index
    %8 = arith.index_cast %1 : i32 to index
    %c0_6 = arith.constant 0 : index
    %9 = vector.load %arg2[%c0_5, %8, %c0_6] : memref<1x8x32xf32, #tpu.memory_space<vmem>>, vector<1x8x32xf32>
    %10 = vector.shape_cast %9 : vector<1x8x32xf32> to vector<8x32xf32>
    %11 = vector.broadcast %3 : vector<1x32xf32> to vector<8x32xf32>
    %12 = arith.addf %10, %11 : vector<8x32xf32>
    %c0_7 = arith.constant 0 : index
    %c0_8 = arith.constant 0 : index
    %c0_9 = arith.constant 0 : index
    %13 = vector.load %arg5[%c0_7, %c0_8, %c0_9] : memref<1x8x1xf32, #tpu.memory_space<vmem>>, vector<1x8x1xf32>
    %14 = vector.shape_cast %13 : vector<1x8x1xf32> to vector<8x1xf32>
    %c0_10 = arith.constant 0 : index
    %15 = arith.index_cast %1 : i32 to index
    %c0_11 = arith.constant 0 : index
    %16 = vector.load %arg5[%c0_10, %15, %c0_11] : memref<1x8x1xf32, #tpu.memory_space<vmem>>, vector<1x8x1xf32>
    %17 = vector.shape_cast %16 : vector<1x8x1xf32> to vector<8x1xf32>
    %18 = vector.shape_cast %17 : vector<8x1xf32> to vector<8x1x1xf32>
    %19 = vector.shape_cast %14 : vector<8x1xf32> to vector<1x8x1xf32>
    %20 = vector.broadcast %18 : vector<8x1x1xf32> to vector<8x8x1xf32>
    %21 = vector.broadcast %19 : vector<1x8x1xf32> to vector<8x8x1xf32>
    %22 = arith.mulf %20, %21 : vector<8x8x1xf32>
    %c0_12 = arith.constant 0 : index
    %c0_13 = arith.constant 0 : index
    %c0_14 = arith.constant 0 : index
    %c0_15 = arith.constant 0 : index
    %23 = vector.load %arg4[%c0_12, %c0_13, %c0_14, %c0_15] : memref<1x8x8x16xbf16, #tpu.memory_space<vmem>>, vector<1x8x8x16xbf16>
    %24 = vector.shape_cast %23 : vector<1x8x8x16xbf16> to vector<8x8x16xbf16>
    %25 = vector.shape_cast %24 : vector<8x8x16xbf16> to vector<64x16xbf16>
    %26 = arith.truncf %12 : vector<8x32xf32> to vector<8x32xbf16>
    %c0_16 = arith.constant 0 : index
    %c0_17 = arith.constant 0 : index
    %27 = vector.load %arg6[%c0_16, %c0_17] : memref<32x16xf32, #tpu.memory_space<vmem>>, vector<32x16xf32>
    %28 = arith.truncf %27 : vector<32x16xf32> to vector<32x16xbf16>
    %cst = arith.constant dense<0.000000e+00> : vector<8x16xf32>
    %29 = tpu.matmul %26, %28, %cst {dimension_numbers = #tpu.dot_dimension_numbers<[1], [0], [0], [1], [0, 0, 1, 1], [], []>} : vector<8x32xbf16>, vector<32x16xbf16>, vector<8x16xf32> -> vector<8x16xf32>
    %c0_18 = arith.constant 0 : index
    %c0_19 = arith.constant 0 : index
    %30 = vector.load %arg9[%c0_18, %c0_19] : memref<1x16xf32, #tpu.memory_space<vmem>>, vector<1x16xf32>
    %31 = vector.broadcast %30 : vector<1x16xf32> to vector<8x16xf32>
    %32 = arith.addf %29, %31 : vector<8x16xf32>
    %33 = arith.truncf %7 : vector<8x32xf32> to vector<8x32xbf16>
    %c0_20 = arith.constant 0 : index
    %c0_21 = arith.constant 0 : index
    %34 = vector.load %arg7[%c0_20, %c0_21] : memref<32x16xf32, #tpu.memory_space<vmem>>, vector<32x16xf32>
    %35 = arith.truncf %34 : vector<32x16xf32> to vector<32x16xbf16>
    %cst_22 = arith.constant dense<0.000000e+00> : vector<8x16xf32>
    %36 = tpu.matmul %33, %35, %cst_22 {dimension_numbers = #tpu.dot_dimension_numbers<[1], [0], [0], [1], [0, 0, 1, 1], [], []>} : vector<8x32xbf16>, vector<32x16xbf16>, vector<8x16xf32> -> vector<8x16xf32>
    %c0_23 = arith.constant 0 : index
    %c0_24 = arith.constant 0 : index
    %37 = vector.load %arg8[%c0_23, %c0_24] : memref<16x16xf32, #tpu.memory_space<vmem>>, vector<16x16xf32>
    %38 = arith.truncf %37 : vector<16x16xf32> to vector<16x16xbf16>
    %cst_25 = arith.constant dense<0.000000e+00> : vector<64x16xf32>
    %39 = tpu.matmul %25, %38, %cst_25 {dimension_numbers = #tpu.dot_dimension_numbers<[1], [0], [0], [1], [0, 0, 1, 1], [], []>} : vector<64x16xbf16>, vector<16x16xbf16>, vector<64x16xf32> -> vector<64x16xf32>
    %40 = vector.shape_cast %39 : vector<64x16xf32> to vector<8x8x16xf32>
    %41 = vector.shape_cast %32 : vector<8x16xf32> to vector<8x1x16xf32>
    %42 = vector.shape_cast %36 : vector<8x16xf32> to vector<1x8x16xf32>
    %43 = vector.broadcast %41 : vector<8x1x16xf32> to vector<8x8x16xf32>
    %44 = vector.broadcast %42 : vector<1x8x16xf32> to vector<8x8x16xf32>
    %45 = arith.addf %43, %44 : vector<8x8x16xf32>
    %46 = arith.addf %45, %40 : vector<8x8x16xf32>
    %cst_26 = arith.constant 0.000000e+00 : f32
    %47 = vector.broadcast %cst_26 : f32 to vector<8x8x16xf32>
    %48 = arith.maximumf %46, %47 : vector<8x8x16xf32>
    %49 = vector.broadcast %22 : vector<8x8x1xf32> to vector<8x8x16xf32>
    %50 = arith.mulf %48, %49 : vector<8x8x16xf32>
    %cst_27 = arith.constant dense<0.000000e+00> : vector<8x16xf32>
    %51 = vector.multi_reduction <add>, %50, %cst_27 [1] : vector<8x8x16xf32> to vector<8x16xf32>
    %52 = arith.truncf %12 : vector<8x32xf32> to vector<8x32xbf16>
    %c0_28 = arith.constant 0 : index
    %c0_29 = arith.constant 0 : index
    %53 = vector.load %arg10[%c0_28, %c0_29] : memref<32x32xf32, #tpu.memory_space<vmem>>, vector<32x32xf32>
    %54 = arith.truncf %53 : vector<32x32xf32> to vector<32x32xbf16>
    %cst_30 = arith.constant dense<0.000000e+00> : vector<8x32xf32>
    %55 = tpu.matmul %52, %54, %cst_30 {dimension_numbers = #tpu.dot_dimension_numbers<[1], [0], [0], [1], [0, 0, 1, 1], [], []>} : vector<8x32xbf16>, vector<32x32xbf16>, vector<8x32xf32> -> vector<8x32xf32>
    %56 = arith.truncf %51 : vector<8x16xf32> to vector<8x16xbf16>
    %c0_31 = arith.constant 0 : index
    %c0_32 = arith.constant 0 : index
    %57 = vector.load %arg11[%c0_31, %c0_32] : memref<16x32xf32, #tpu.memory_space<vmem>>, vector<16x32xf32>
    %58 = arith.truncf %57 : vector<16x32xf32> to vector<16x32xbf16>
    %cst_33 = arith.constant dense<0.000000e+00> : vector<8x32xf32>
    %59 = tpu.matmul %56, %58, %cst_33 {dimension_numbers = #tpu.dot_dimension_numbers<[1], [0], [0], [1], [0, 0, 1, 1], [], []>} : vector<8x16xbf16>, vector<16x32xbf16>, vector<8x32xf32> -> vector<8x32xf32>
    %60 = arith.addf %55, %59 : vector<8x32xf32>
    %c0_34 = arith.constant 0 : index
    %c0_35 = arith.constant 0 : index
    %61 = vector.load %arg12[%c0_34, %c0_35] : memref<1x32xf32, #tpu.memory_space<vmem>>, vector<1x32xf32>
    %62 = vector.broadcast %61 : vector<1x32xf32> to vector<8x32xf32>
    %63 = arith.addf %60, %62 : vector<8x32xf32>
    %cst_36 = arith.constant 0.000000e+00 : f32
    %64 = vector.broadcast %cst_36 : f32 to vector<8x32xf32>
    %65 = arith.maximumf %63, %64 : vector<8x32xf32>
    %66 = vector.broadcast %17 : vector<8x1xf32> to vector<8x32xf32>
    %67 = arith.mulf %65, %66 : vector<8x32xf32>
    %68 = arith.addf %12, %67 : vector<8x32xf32>
    %cst_37 = arith.constant dense<0.000000e+00> : vector<8xf32>
    %69 = vector.multi_reduction <add>, %68, %cst_37 [1] : vector<8x32xf32> to vector<8xf32>
    %70 = vector.shape_cast %69 : vector<8xf32> to vector<8x1xf32>
    %cst_38 = arith.constant 3.200000e+01 : f32
    %71 = vector.broadcast %cst_38 : f32 to vector<8x1xf32>
    %72 = arith.divf %70, %71 : vector<8x1xf32>
    %73 = vector.broadcast %72 : vector<8x1xf32> to vector<8x32xf32>
    %74 = arith.subf %68, %73 : vector<8x32xf32>
    %75 = arith.mulf %74, %74 : vector<8x32xf32>
    %cst_39 = arith.constant dense<0.000000e+00> : vector<8xf32>
    %76 = vector.multi_reduction <add>, %75, %cst_39 [1] : vector<8x32xf32> to vector<8xf32>
    %77 = vector.shape_cast %76 : vector<8xf32> to vector<8x1xf32>
    %cst_40 = arith.constant 3.200000e+01 : f32
    %78 = vector.broadcast %cst_40 : f32 to vector<8x1xf32>
    %79 = arith.divf %77, %78 : vector<8x1xf32>
    %80 = vector.broadcast %72 : vector<8x1xf32> to vector<8x32xf32>
    %81 = arith.subf %68, %80 : vector<8x32xf32>
    %cst_41 = arith.constant 9.99999974E-6 : f32
    %82 = vector.broadcast %cst_41 : f32 to vector<8x1xf32>
    %83 = arith.addf %79, %82 : vector<8x1xf32>
    %84 = math.rsqrt %83 : vector<8x1xf32>
    %85 = vector.broadcast %84 : vector<8x1xf32> to vector<8x32xf32>
    %86 = arith.mulf %81, %85 : vector<8x32xf32>
    %c0_42 = arith.constant 0 : index
    %c0_43 = arith.constant 0 : index
    %87 = vector.load %arg13[%c0_42, %c0_43] : memref<1x32xf32, #tpu.memory_space<vmem>>, vector<1x32xf32>
    %88 = vector.broadcast %87 : vector<1x32xf32> to vector<8x32xf32>
    %89 = arith.mulf %86, %88 : vector<8x32xf32>
    %c0_44 = arith.constant 0 : index
    %c0_45 = arith.constant 0 : index
    %90 = vector.load %arg14[%c0_44, %c0_45] : memref<1x32xf32, #tpu.memory_space<vmem>>, vector<1x32xf32>
    %91 = vector.broadcast %90 : vector<1x32xf32> to vector<8x32xf32>
    %92 = arith.addf %89, %91 : vector<8x32xf32>
    %c0_46 = arith.constant 0 : index
    %c0_47 = arith.constant 0 : index
    %c0_48 = arith.constant 0 : index
    %93 = vector.load %arg17[%c0_46, %c0_47, %c0_48] : memref<1x8x32xf32, #tpu.memory_space<vmem>>, vector<1x8x32xf32>
    %94 = vector.shape_cast %93 : vector<1x8x32xf32> to vector<8x32xf32>
    %95 = vector.shape_cast %92 : vector<8x32xf32> to vector<1x8x32xf32>
    tpu.vector_store %arg17[%c0_46, %c0_47, %c0_48], %95 {strides = array<i32>} : memref<1x8x32xf32, #tpu.memory_space<vmem>>, vector<1x8x32xf32>,
    %c0_49 = arith.constant 0 : index
    %c0_50 = arith.constant 0 : index
    %c0_51 = arith.constant 0 : index
    %c0_52 = arith.constant 0 : index
    %96 = vector.load %arg4[%c0_49, %c0_50, %c0_51, %c0_52] : memref<1x8x8x16xbf16, #tpu.memory_space<vmem>>, vector<1x8x8x16xbf16>
    %97 = vector.shape_cast %96 : vector<1x8x8x16xbf16> to vector<8x8x16xbf16>
    %98 = arith.extf %97 : vector<8x8x16xbf16> to vector<8x8x16xf32>
    %99 = arith.addf %98, %50 : vector<8x8x16xf32>
    %100 = vector.shape_cast %99 : vector<8x8x16xf32> to vector<64x16xf32>
    %101 = arith.truncf %100 : vector<64x16xf32> to vector<64x16xbf16>
    %c0_53 = arith.constant 0 : index
    %c0_54 = arith.constant 0 : index
    %102 = vector.load %arg15[%c0_53, %c0_54] : memref<16x2xf32, #tpu.memory_space<vmem>>, vector<16x2xf32>
    %103 = arith.truncf %102 : vector<16x2xf32> to vector<16x2xbf16>
    %cst_55 = arith.constant dense<0.000000e+00> : vector<64x2xf32>
    %104 = tpu.matmul %101, %103, %cst_55 {dimension_numbers = #tpu.dot_dimension_numbers<[1], [0], [0], [1], [0, 0, 1, 1], [], []>} : vector<64x16xbf16>, vector<16x2xbf16>, vector<64x2xf32> -> vector<64x2xf32>
    %c0_56 = arith.constant 0 : index
    %c0_57 = arith.constant 0 : index
    %105 = vector.load %arg16[%c0_56, %c0_57] : memref<1x2xf32, #tpu.memory_space<vmem>>, vector<1x2xf32>
    %106 = vector.broadcast %105 : vector<1x2xf32> to vector<64x2xf32>
    %107 = arith.addf %104, %106 : vector<64x2xf32>
    %108 = vector.shape_cast %107 : vector<64x2xf32> to vector<8x8x2xf32>
    %c0_58 = arith.constant 0 : index
    %c0_59 = arith.constant 0 : index
    %c0_60 = arith.constant 0 : index
    %c0_61 = arith.constant 0 : index
    %109 = vector.load %arg18[%c0_58, %c0_59, %c0_60, %c0_61] : memref<1x8x8x2xf32, #tpu.memory_space<vmem>>, vector<1x8x8x2xf32>
    %110 = vector.shape_cast %109 : vector<1x8x8x2xf32> to vector<8x8x2xf32>
    %111 = vector.shape_cast %108 : vector<8x8x2xf32> to vector<1x8x8x2xf32>
    tpu.vector_store %arg18[%c0_58, %c0_59, %c0_60, %c0_61], %111 {strides = array<i32>} : memref<1x8x8x2xf32, #tpu.memory_space<vmem>>, vector<1x8x8x2xf32>,
    return
  }
  func.func @transform_0(%arg0: i32, %arg1: i32) -> (i32, i32, i32) {
    %c0_i32 = arith.constant 0 : i32
    %c0_i32_0 = arith.constant 0 : i32
    %c0_i32_1 = arith.constant 0 : i32
    return %arg0, %c0_i32, %c0_i32_0 : i32, i32, i32
  }
  func.func @transform_1(%arg0: i32, %arg1: i32) -> (i32, i32, i32) {
    %c0_i32 = arith.constant 0 : i32
    %c0_i32_0 = arith.constant 0 : i32
    %c0_i32_1 = arith.constant 0 : i32
    return %arg0, %c0_i32, %c0_i32_0 : i32, i32, i32
  }
  func.func @transform_2(%arg0: i32, %arg1: i32) -> (i32, i32, i32, i32) {
    %c0_i32 = arith.constant 0 : i32
    %c0_i32_0 = arith.constant 0 : i32
    %c0_i32_1 = arith.constant 0 : i32
    return %arg0, %arg1, %c0_i32, %c0_i32_0 : i32, i32, i32, i32
  }
  func.func @transform_3(%arg0: i32, %arg1: i32) -> (i32, i32, i32) {
    %c0_i32 = arith.constant 0 : i32
    %c0_i32_0 = arith.constant 0 : i32
    %c0_i32_1 = arith.constant 0 : i32
    return %arg0, %c0_i32, %c0_i32_0 : i32, i32, i32
  }
  func.func @transform_4(%arg0: i32, %arg1: i32) -> (i32, i32) {
    %c0_i32 = arith.constant 0 : i32
    %c0_i32_0 = arith.constant 0 : i32
    %c0_i32_1 = arith.constant 0 : i32
    return %c0_i32, %c0_i32_0 : i32, i32
  }
  func.func @transform_5(%arg0: i32, %arg1: i32) -> (i32, i32) {
    %c0_i32 = arith.constant 0 : i32
    %c0_i32_0 = arith.constant 0 : i32
    %c0_i32_1 = arith.constant 0 : i32
    return %c0_i32, %c0_i32_0 : i32, i32
  }
  func.func @transform_6(%arg0: i32, %arg1: i32) -> (i32, i32) {
    %c0_i32 = arith.constant 0 : i32
    %c0_i32_0 = arith.constant 0 : i32
    %c0_i32_1 = arith.constant 0 : i32
    return %c0_i32, %c0_i32_0 : i32, i32
  }
  func.func @transform_7(%arg0: i32, %arg1: i32) -> (i32, i32) {
    %c0_i32 = arith.constant 0 : i32
    %c0_i32_0 = arith.constant 0 : i32
    %c0_i32_1 = arith.constant 0 : i32
    return %c0_i32, %c0_i32_0 : i32, i32
  }
  func.func @transform_8(%arg0: i32, %arg1: i32) -> (i32, i32) {
    %c0_i32 = arith.constant 0 : i32
    %c0_i32_0 = arith.constant 0 : i32
    %c0_i32_1 = arith.constant 0 : i32
    return %c0_i32, %c0_i32_0 : i32, i32
  }
  func.func @transform_9(%arg0: i32, %arg1: i32) -> (i32, i32) {
    %c0_i32 = arith.constant 0 : i32
    %c0_i32_0 = arith.constant 0 : i32
    %c0_i32_1 = arith.constant 0 : i32
    return %c0_i32, %c0_i32_0 : i32, i32
  }
  func.func @transform_10(%arg0: i32, %arg1: i32) -> (i32, i32) {
    %c0_i32 = arith.constant 0 : i32
    %c0_i32_0 = arith.constant 0 : i32
    %c0_i32_1 = arith.constant 0 : i32
    return %c0_i32, %c0_i32_0 : i32, i32
  }
  func.func @transform_11(%arg0: i32, %arg1: i32) -> (i32, i32) {
    %c0_i32 = arith.constant 0 : i32
    %c0_i32_0 = arith.constant 0 : i32
    %c0_i32_1 = arith.constant 0 : i32
    return %c0_i32, %c0_i32_0 : i32, i32
  }
  func.func @transform_12(%arg0: i32, %arg1: i32) -> (i32, i32) {
    %c0_i32 = arith.constant 0 : i32
    %c0_i32_0 = arith.constant 0 : i32
    %c0_i32_1 = arith.constant 0 : i32
    return %c0_i32, %c0_i32_0 : i32, i32
  }
  func.func @transform_13(%arg0: i32, %arg1: i32) -> (i32, i32) {
    %c0_i32 = arith.constant 0 : i32
    %c0_i32_0 = arith.constant 0 : i32
    %c0_i32_1 = arith.constant 0 : i32
    return %c0_i32, %c0_i32_0 : i32, i32
  }
  func.func @transform_14(%arg0: i32, %arg1: i32) -> (i32, i32) {
    %c0_i32 = arith.constant 0 : i32
    %c0_i32_0 = arith.constant 0 : i32
    %c0_i32_1 = arith.constant 0 : i32
    return %c0_i32, %c0_i32_0 : i32, i32
  }
  func.func @transform_15(%arg0: i32, %arg1: i32) -> (i32, i32, i32) {
    %c0_i32 = arith.constant 0 : i32
    %c0_i32_0 = arith.constant 0 : i32
    return %arg0, %arg1, %c0_i32 : i32, i32, i32
  }
  func.func @transform_16(%arg0: i32, %arg1: i32) -> (i32, i32, i32, i32) {
    %c0_i32 = arith.constant 0 : i32
    %c0_i32_0 = arith.constant 0 : i32
    %c0_i32_1 = arith.constant 0 : i32
    return %arg0, %arg1, %c0_i32, %c0_i32_0 : i32, i32, i32, i32
  }
}

module attributes {stable_mosaic.version = 11 : i64} {
  func.func @_mlp2_kernel(%arg0: i32, %arg1: memref<16x32xf32, #tpu.memory_space<vmem>>, %arg2: memref<32x32xf32, #tpu.memory_space<vmem>>, %arg3: memref<1x32xf32, #tpu.memory_space<vmem>>, %arg4: memref<32x4xf32, #tpu.memory_space<vmem>>, %arg5: memref<1x4xf32, #tpu.memory_space<vmem>>, %arg6: memref<16x4xf32, #tpu.memory_space<vmem>>) attributes {dimension_semantics = [#tpu.dimension_semantics<parallel>], iteration_bounds = array<i64: 1>, scalar_prefetch = 0 : i64, scratch_operands = 0 : i64, tpu.core_type = #tpu.core_type<tc>, window_params = [{transform_indices = @transform_0, window_bounds = array<i64: 16, 32>}, {pipeline_mode = #tpu.pipeline_mode<synchronous>, transform_indices = @transform_1, window_bounds = array<i64: 32, 32>}, {pipeline_mode = #tpu.pipeline_mode<synchronous>, transform_indices = @transform_2, window_bounds = array<i64: 1, 32>}, {pipeline_mode = #tpu.pipeline_mode<synchronous>, transform_indices = @transform_3, window_bounds = array<i64: 32, 4>}, {pipeline_mode = #tpu.pipeline_mode<synchronous>, transform_indices = @transform_4, window_bounds = array<i64: 1, 4>}, {transform_indices = @transform_5, window_bounds = array<i64: 16, 4>}]} {
    %c0 = arith.constant 0 : index
    %c0_0 = arith.constant 0 : index
    %0 = vector.load %arg1[%c0, %c0_0] : memref<16x32xf32, #tpu.memory_space<vmem>>, vector<16x32xf32>
    %1 = arith.truncf %0 : vector<16x32xf32> to vector<16x32xbf16>
    %c0_1 = arith.constant 0 : index
    %c0_2 = arith.constant 0 : index
    %2 = vector.load %arg2[%c0_1, %c0_2] : memref<32x32xf32, #tpu.memory_space<vmem>>, vector<32x32xf32>
    %3 = arith.truncf %2 : vector<32x32xf32> to vector<32x32xbf16>
    %cst = arith.constant dense<0.000000e+00> : vector<16x32xf32>
    %4 = tpu.matmul %1, %3, %cst {dimension_numbers = #tpu.dot_dimension_numbers<[1], [0], [0], [1], [0, 0, 1, 1], [], []>} : vector<16x32xbf16>, vector<32x32xbf16>, vector<16x32xf32> -> vector<16x32xf32>
    %c0_3 = arith.constant 0 : index
    %c0_4 = arith.constant 0 : index
    %5 = vector.load %arg3[%c0_3, %c0_4] : memref<1x32xf32, #tpu.memory_space<vmem>>, vector<1x32xf32>
    %6 = vector.broadcast %5 : vector<1x32xf32> to vector<16x32xf32>
    %7 = arith.addf %4, %6 : vector<16x32xf32>
    %cst_5 = arith.constant 0.000000e+00 : f32
    %8 = vector.broadcast %cst_5 : f32 to vector<16x32xf32>
    %9 = arith.maximumf %7, %8 : vector<16x32xf32>
    %10 = arith.truncf %9 : vector<16x32xf32> to vector<16x32xbf16>
    %c0_6 = arith.constant 0 : index
    %c0_7 = arith.constant 0 : index
    %11 = vector.load %arg4[%c0_6, %c0_7] : memref<32x4xf32, #tpu.memory_space<vmem>>, vector<32x4xf32>
    %12 = arith.truncf %11 : vector<32x4xf32> to vector<32x4xbf16>
    %cst_8 = arith.constant dense<0.000000e+00> : vector<16x4xf32>
    %13 = tpu.matmul %10, %12, %cst_8 {dimension_numbers = #tpu.dot_dimension_numbers<[1], [0], [0], [1], [0, 0, 1, 1], [], []>} : vector<16x32xbf16>, vector<32x4xbf16>, vector<16x4xf32> -> vector<16x4xf32>
    %c0_9 = arith.constant 0 : index
    %c0_10 = arith.constant 0 : index
    %14 = vector.load %arg5[%c0_9, %c0_10] : memref<1x4xf32, #tpu.memory_space<vmem>>, vector<1x4xf32>
    %15 = vector.broadcast %14 : vector<1x4xf32> to vector<16x4xf32>
    %16 = arith.addf %13, %15 : vector<16x4xf32>
    %c0_11 = arith.constant 0 : index
    %c0_12 = arith.constant 0 : index
    %17 = vector.load %arg6[%c0_11, %c0_12] : memref<16x4xf32, #tpu.memory_space<vmem>>, vector<16x4xf32>
    tpu.vector_store %arg6[%c0_11, %c0_12], %16 {strides = array<i32>} : memref<16x4xf32, #tpu.memory_space<vmem>>, vector<16x4xf32>,
    return
  }
  func.func @transform_0(%arg0: i32) -> (i32, i32) {
    %c0_i32 = arith.constant 0 : i32
    %c0_i32_0 = arith.constant 0 : i32
    return %arg0, %c0_i32 : i32, i32
  }
  func.func @transform_1(%arg0: i32) -> (i32, i32) {
    %c0_i32 = arith.constant 0 : i32
    %c0_i32_0 = arith.constant 0 : i32
    %c0_i32_1 = arith.constant 0 : i32
    return %c0_i32, %c0_i32_0 : i32, i32
  }
  func.func @transform_2(%arg0: i32) -> (i32, i32) {
    %c0_i32 = arith.constant 0 : i32
    %c0_i32_0 = arith.constant 0 : i32
    %c0_i32_1 = arith.constant 0 : i32
    return %c0_i32, %c0_i32_0 : i32, i32
  }
  func.func @transform_3(%arg0: i32) -> (i32, i32) {
    %c0_i32 = arith.constant 0 : i32
    %c0_i32_0 = arith.constant 0 : i32
    %c0_i32_1 = arith.constant 0 : i32
    return %c0_i32, %c0_i32_0 : i32, i32
  }
  func.func @transform_4(%arg0: i32) -> (i32, i32) {
    %c0_i32 = arith.constant 0 : i32
    %c0_i32_0 = arith.constant 0 : i32
    %c0_i32_1 = arith.constant 0 : i32
    return %c0_i32, %c0_i32_0 : i32, i32
  }
  func.func @transform_5(%arg0: i32) -> (i32, i32) {
    %c0_i32 = arith.constant 0 : i32
    %c0_i32_0 = arith.constant 0 : i32
    return %arg0, %c0_i32 : i32, i32
  }
}

</mosaic_0001>

<bundles_post_ra>
// kernel: dense_gnn2_forward.6
= control target key start
LH: loop header
LB: loop body
LE: loop exit
PB: predicated region body
PF: predicated region fallthrough
CT: control target
= control target key end

     0   :  { %v174_v0 = vmov 0.0   ;;  %vm37_vm0 = vcmask 1041408   ;;  %vm175_vm1 = vmmov 0   ;;  %vm33_vm2 = vcmask 31744   ;;  %s239_s1 = inlined_call_operand.vmem [shape: f32[4,32], index: 1, kind: input, shape index: {}]   ;;  %s240_s0 = inlined_call_operand.vmem [shape: f32[16,4], index: 0, kind: input, shape index: {}]   ;;  %s241_s3 = inlined_call_operand.vmem [shape: f32[32,32], index: 3, kind: input, shape index: {}]   ;;  %s242_s2 = inlined_call_operand.vmem [shape: f32[1,32], index: 2, kind: input, shape index: {}]   ;;  %s243_s4 = inlined_call_operand.vmem [shape: f32[1,32], index: 4, kind: input, shape index: {}]   ;;  %s244_s5 = inlined_call_operand.vmem [shape: f32[16,32], index: 5, kind: output, shape index: {}]  }
   0x1   :  { %158 = vmatprep.subr.bf16.mxu0 %v174_v0  ;;  %v24_v1 = vld [vmem:[%s239_s1] sm:$0xf]  ;;  %160 = vmatprep.mubr.msk.bf16.mxu0 %vm175_vm1, %v174_v0  ;;  %v22_v3 = vld [vmem:[%s240_s0 + $0x8] sm:$0xff]  ;;  %v87_v10 = vld [vmem:[%s241_s3 + $0x10] sm:$0xff]  ;;  %vm98_vm3 = vcmask 261120  }
   0x2   :  { %v21_v2 = vld [vmem:[%s240_s0] sm:$0xff]  ;;  %v25_v4 = vpack.c.bf16 %v24_v1, %v24_v1  ;;  %164 = vmatprep.subr.bf16.mxu1 %v174_v0  ;;  %168 = vmatprep.mubr.msk.bf16.mxu1 %vm175_vm1, %v174_v0  ;;  %v86_v8 = vld [vmem:[%s241_s3 + $0x8] sm:$0xff]  ;;  %v88_v11 = vld [vmem:[%s241_s3 + $0x18] sm:$0xff] }
   0x3   :  { %v23_v6 = vpack.c.bf16 %v22_v3, %v21_v2  ;;  %v85_v7 = vld [vmem:[%s241_s3] sm:$0xff]  ;;  %v90_v12 = vpack.c.bf16 %v88_v11, %v87_v10 }
   0x4   :  { %v39_v5 = vsel %vm37_vm0, %v25_v4, 0  ;;  %v89_v9 = vpack.c.bf16 %v86_v8, %v85_v7  ;;  %v149_v13 = vld [vmem:[%s242_s2] ss:$0 sm:$0xff] }
   0x5   :  { %159 = vmatpush3.bf16.msra.mxu0 %v39_v5  ;;  %v151_v23 = vld [vmem:[%s243_s4] ss:$0 sm:$0xff] }
   0x6   :  { %165 = vmatpush3.bf16.msra.mxu1 %v89_v9 }
   0x7   :  { %166 = vmatprep.subr.bf16.mxu1 %v174_v0 }
   0x8   :  { %161 = vmatmul.mubr.msk.bf16.vlgmr.msra.gmra.mrb[0].mxu0 %vm33_vm2, %v23_v6 }
   0xa   :  { %167 = vmatpush3.bf16.msra.mxu1 %v90_v12 }
  0xdb   :  { %v75_v14 = vpop.f32.mrb[0].mxu0 }
  0xdc   :  { %v76_v15 = vadd.f32 %v149_v13, %v75_v14  ;;  %v162_v16 = vpop.f32.mrb[1].mxu0 }
  0xdd   :  { %v78_v17 = vpop.f32.mrb[2].mxu0 }
  0xde   :  { %v79_v18 = vadd.f32 %v149_v13, %v78_v17  ;;  %v163_v19 = vpop.f32.mrb[3].mxu0  ;;  %v82_v20 = vmax.f32 %v76_v15, 0.0 }
  0xe0   :  { %v83_v21 = vmax.f32 %v79_v18, 0.0 }
  0xe2   :  { %v84_v22 = vpack.c.bf16 %v83_v21, %v82_v20 }
  0xe4   :  { %169 = vmatmul.mubr.msk.bf16.vlgmr.msra.gmra.mrb[0].mxu1 %vm98_vm3, %v84_v22 }
 0x1b7   :  { %v136_v24 = vpop.f32.mrb[0].mxu1 }
 0x1b8   :  { %v137_v25 = vadd.f32 %v151_v23, %v136_v24  ;;  %v170_v26 = vpop.f32.mrb[1].mxu1 }
 0x1b9   :  { %v139_v27 = vpop.f32.mrb[2].mxu1 }
 0x1ba   :  { %143 = vst.msk [vmem:[%s244_s5] sm:$0xff] %vm98_vm3, %v137_v25  ;;  %v140_v28 = vadd.f32 %v151_v23, %v139_v27  ;;  %v171_v29 = vpop.f32.mrb[3].mxu1 }
 0x1bc   :  { %144 = vst.msk [vmem:[%s244_s5 + $0x8] sm:$0xff] %vm98_vm3, %v140_v28 }

// kernel: dense_gnn2_forward.7
= control target key start
LH: loop header
LB: loop body
LE: loop exit
PB: predicated region body
PF: predicated region fallthrough
CT: control target
= control target key end

     0   :  { %v172_v0 = vmov 0.0   ;;  %vm173_vm0 = vmmov 0   ;;  %vm36_vm1 = vcmask 261120   ;;  %vm138_vm2 = vcmask 254976   ;;  %s242_s1 = inlined_call_operand.vmem [shape: f32[32,32], index: 1, kind: input, shape index: {}]   ;;  %s243_s0 = inlined_call_operand.vmem [shape: f32[2,32], index: 0, kind: input, shape index: {}]   ;;  %s244_s3 = inlined_call_operand.vmem [shape: f32[32,32], index: 3, kind: input, shape index: {}]   ;;  %s245_s2 = inlined_call_operand.vmem [shape: f32[1,32], index: 2, kind: input, shape index: {}]   ;;  %s246_s4 = inlined_call_operand.vmem [shape: f32[1,32], index: 4, kind: input, shape index: {}]   ;;  %s247_s5 = inlined_call_operand.vmem [shape: f32[2,32], index: 5, kind: output, shape index: {}]  }
   0x1   :  { %154 = vmatprep.subr.bf16.mxu0 %v172_v0  ;;  %v23_v1 = vld [vmem:[%s242_s1] sm:$0xff]  ;;  %v24_v2 = vld [vmem:[%s242_s1 + $0x8] sm:$0xff]  ;;  %v25_v3 = vld [vmem:[%s242_s1 + $0x10] sm:$0xff]  ;;  %158 = vmatprep.mubr.msk.bf16.mxu0 %vm173_vm0, %v172_v0 }
   0x2   :  { %v27_v4 = vpack.c.bf16 %v24_v2, %v23_v1  ;;  %v26_v5 = vld [vmem:[%s242_s1 + $0x18] sm:$0xff]  ;;  %162 = vmatprep.subr.bf16.mxu1 %v172_v0  ;;  %166 = vmatprep.mubr.msk.bf16.mxu1 %vm173_vm0, %v172_v0  ;;  %v21_v7 = vld [vmem:[%s243_s0] sm:$0x3]  ;;  %v83_v10 = vld [vmem:[%s244_s3 + $0x8] sm:$0xff] }
   0x3   :  { %v28_v6 = vpack.c.bf16 %v26_v5, %v25_v3  ;;  %v22_v8 = vpack.c.bf16 %v21_v7, %v21_v7  ;;  %v82_v9 = vld [vmem:[%s244_s3] sm:$0xff]  ;;  %v84_v12 = vld [vmem:[%s244_s3 + $0x10] sm:$0xff]  ;;  %v85_v13 = vld [vmem:[%s244_s3 + $0x18] sm:$0xff] }
   0x4   :  { %155 = vmatpush3.bf16.msra.mxu0 %v27_v4  ;;  %v86_v11 = vpack.c.bf16 %v83_v10, %v82_v9  ;;  %v87_v14 = vpack.c.bf16 %v85_v13, %v84_v12  ;;  %v144_v15 = vld [vmem:[%s245_s2] ss:$0 sm:$0xff] }
   0x5   :  { %156 = vmatprep.subr.bf16.mxu0 %v172_v0  ;;  %v146_v23 = vld [vmem:[%s246_s4] ss:$0 sm:$0xff] }
   0x6   :  { %163 = vmatpush3.bf16.msra.mxu1 %v86_v11 }
   0x7   :  { %164 = vmatprep.subr.bf16.mxu1 %v172_v0 }
   0x8   :  { %157 = vmatpush3.bf16.msra.mxu0 %v28_v6 }
   0xa   :  { %165 = vmatpush3.bf16.msra.mxu1 %v87_v14 }
   0xb   :  { %159 = vmatmul.mubr.msk.bf16.vlgmr.msra.gmra.mrb[0].mxu0 %vm36_vm1, %v22_v8 }
  0xde   :  { %v74_v16 = vpop.f32.mrb[0].mxu0 }
  0xdf   :  { %v75_v17 = vadd.f32 %v144_v15, %v74_v16  ;;  %v160_v18 = vpop.f32.mrb[1].mxu0 }
  0xe0   :  { %v77_v19 = vpop.f32.mrb[2].mxu0 }
  0xe1   :  { %v80_v20 = vmax.f32 %v75_v17, 0.0  ;;  %v161_v21 = vpop.f32.mrb[3].mxu0 }
  0xe3   :  { %v81_v22 = vpack.c.bf16 %v80_v20, %v80_v20 }
  0xe5   :  { %167 = vmatmul.mubr.msk.bf16.vlgmr.msra.gmra.mrb[0].mxu1 %vm36_vm1, %v81_v22 }
 0x1b8   :  { %v132_v24 = vpop.f32.mrb[0].mxu1 }
 0x1b9   :  { %v133_v25 = vadd.f32 %v146_v23, %v132_v24  ;;  %v168_v26 = vpop.f32.mrb[1].mxu1 }
 0x1ba   :  { %v135_v27 = vpop.f32.mrb[2].mxu1 }
 0x1bb   :  { %139 = vst.msk [vmem:[%s247_s5] sm:$0x3] %vm138_vm2, %v133_v25  ;;  %v169_v28 = vpop.f32.mrb[3].mxu1 }

// kernel: dense_gnn2_forward.8
= control target key start
LH: loop header
LB: loop body
LE: loop exit
PB: predicated region body
PF: predicated region fallthrough
CT: control target
= control target key end

     0   :  { %s1876_s21 = smov 0   ;;  %s1878_s22 = smov 0   ;;  %s2145_s0 = inlined_call_operand.vmem [shape: f32[2,8,32], index: 0, kind: input, shape index: {}]   ;;  %s2146_s1 = inlined_call_operand.vmem [shape: f32[2,1,32], index: 1, kind: input, shape index: {}]   ;;  %s2147_s2 = inlined_call_operand.vmem [shape: f32[2,8,8,2], index: 2, kind: input, shape index: {}]   ;;  %s2148_s3 = inlined_call_operand.vmem [shape: f32[2,8,1], index: 3, kind: input, shape index: {}]   ;;  %s2149_s4 = inlined_call_operand.vmem [shape: f32[32,16], index: 4, kind: input, shape index: {}]   ;;  %s2150_s5 = inlined_call_operand.vmem [shape: f32[32,16], index: 5, kind: input, shape index: {}]   ;;  %s2151_s6 = inlined_call_operand.vmem [shape: f32[16,16], index: 6, kind: input, shape index: {}]   ;;  %s2152_s7 = inlined_call_operand.vmem [shape: f32[1,16], index: 7, kind: input, shape index: {}]   ;;  %s2153_s8 = inlined_call_operand.vmem [shape: f32[32,32], index: 8, kind: input, shape index: {}]   ;;  %s2154_s9 = inlined_call_operand.vmem [shape: f32[16,32], index: 9, kind: input, shape index: {}]   ;;  %s2155_s10 = inlined_call_operand.vmem [shape: f32[1,32], index: 10, kind: input, shape index: {}]   ;;  %s2156_s11 = inlined_call_operand.vmem [shape: f32[1,32], index: 11, kind: input, shape index: {}]   ;;  %s2157_s12 = inlined_call_operand.vmem [shape: f32[1,32], index: 12, kind: input, shape index: {}]   ;;  %s2158_s13 = inlined_call_operand.vmem [shape: f32[2,16], index: 13, kind: input, shape index: {}]   ;;  %s2159_s14 = inlined_call_operand.vmem [shape: f32[1,16], index: 14, kind: input, shape index: {}]   ;;  %s2160_s15 = inlined_call_operand.vmem [shape: f32[2,8,32], index: 15, kind: output, shape index: {0}]   ;;  %s2161_s16 = inlined_call_operand.vmem [shape: bf16[2,8,8,16], index: 16, kind: output, shape index: {1}]  }
   0x1   :  { %2162 = sst [smem:[#allocation2_spill]] %s2145_s0  ;;  %s1880_s23 = smov 0  }
   0x2   :  { %2163 = sst [smem:[#allocation3_spill]] %s2149_s4 }
   0x3 LB: > { %s39_s24 = sadd.s32 1, %s1781_s22  ;;  %p1628_p0 = scmp.ge.s32.totalorder %s1785_s23, 1  ;;  %s1785_s23 = sphi %s1880_s23, %s27_s23   ;;  %s1781_s22 = sphi %s1878_s22, %s2167_s22   ;;  %s1777_s21 = sphi %s1876_s21, %s2166_s21  }
   0x4   : > { %p41_p1 = scmp.ge.s32.totalorder %s39_s24, 2  ;;  %p514_p2 = scmp.lt.s32.totalorder %s1785_s23, 3 }
   0x6   : > { %s2169_s24 = smov (%p41_p1, %s39_s24), 0  ;;  %p515_p3 = pnand %p1628_p0, %p514_p2 }
   0x7   : > { %v755_v0 = vld [vmem:[%s2158_s13] sm:$0x3] (!%p515_p3)  ;;  %vm777_vm0 = vcmask (!%p515_p3), 1040384   ;;  %p590_p4 = scmp.lt.s32.totalorder (!%p515_p3), %s1777_s21, 1  ;;  %v1787_v2 = vmov (!%p515_p3), 0.0   ;;  %s2164_s4 = sld [smem:[#allocation3_spill]] (!%p515_p3)  ;;  %v650_v35 = vlaneseq (!%p515_p3) }
   0x8   : > { %518 = sbr.rel (%p515_p3) target bundleno = 1045 (0x415), region = 80  ;;  %v756_v1 = vpack.c.bf16 (!%p515_p3), %v755_v0, %v755_v0  ;;  %1689 = vmatprep.subr.bf16.mxu1 (!%p515_p3), %v1787_v2  ;;  %v958_v5 = vld [vmem:[%s2151_s6] sm:$0xff] (!%p515_p3)  ;;  %v959_v7 = vld [vmem:[%s2151_s6 + $0x8] sm:$0xff] (!%p515_p3)  ;;  %vm1788_vm1 = vmmov (!%p515_p3), 0   ;;  %vm764_vm2 = vcmask (!%p515_p3), 15360   ;;  %s2165_s20 = sld [smem:[#allocation2_spill]] (!%p515_p3) }
   0x9   : > { %1693 = vmatprep.mubr.msk.bf16.mxu1 (!%p515_p3), %vm1788_vm1, %v1787_v2  ;;  %v960_v11 = vpack.c.bf16 (!%p515_p3), %v959_v7, %v958_v5  ;;  %vm864_vm3 = vcmask (!%p515_p3), 261120   ;;  %v909_v29 = vld [vmem:[%s2150_s5] sm:$0xff] (!%p515_p3)  ;;  %v910_v30 = vld [vmem:[%s2150_s5 + $0x8] sm:$0xff] (!%p515_p3)  ;;  %v911_v32 = vld [vmem:[%s2150_s5 + $0x10] sm:$0xff] (!%p515_p3)  ;;  %v1789_v36 = vmov (!%p515_p3), 0   ;;  %v651_v40 = vshrl.u32 (!%p515_p3), %v650_v35, 7 }
   0xa   : > { %1729 = vmatprep.subr.msk.bf16.mxu0 (!%p515_p3), %vm777_vm0, %v756_v1  ;;  %v779_v10 = vsel (!%p515_p3), %vm777_vm0, %v756_v1, 0  ;;  %v913_v31 = vpack.c.bf16 (!%p515_p3), %v910_v30, %v909_v29  ;;  %v912_v33 = vld [vmem:[%s2150_s5 + $0x18] sm:$0xff] (!%p515_p3)  ;;  %1758 = vset.pattern.permute.xlu0 (!%p515_p3), %v1789_v36  ;;  %v1790_v37 = vmov (!%p515_p3), 1966171168   ;;  %vm961_vm4 = vcmask (!%p515_p3), 130048  }
   0xb   : > { %1680 = vmatpush3.bf16.msra.mxu0 (!%p515_p3), %v779_v10  ;;  %v914_v34 = vpack.c.bf16 (!%p515_p3), %v912_v33, %v911_v32  ;;  %v648_v38 = vunpack.c.l.s4 (!%p515_p3), %v1790_v37  ;;  %1759 = vset.pattern.permute.xlu1 (!%p515_p3), %v1789_v36  ;;  %v1978_v45 = vsub.s32 (!%p515_p3), 0, %v651_v40  ;;  %v1642_v37 = vld [vmem:[%s2152_s7] ss:$0 sm:$0xff] (!%p515_p3)  ;;  %vm1450_vm5 = vcmask (!%p515_p3), 125952  }
   0xc   : > { %1705 = vmatprep.subr.bf16.mxu0 (!%p515_p3), %v960_v11  ;;  %vm1290_vm6 = vcmask (!%p515_p3), 1041409   ;;  %vm1292_vm7 = vcmask (!%p515_p3), 1042434   ;;  %vm1294_vm8 = vcmask (!%p515_p3), 1043459   ;;  %vm1296_vm9 = vcmask (!%p515_p3), 1044484  }
   0xd   : > { %v851_v3 = vld [vmem:[%s2164_s4] sm:$0xff] (!%p515_p3)  ;;  %v852_v4 = vld [vmem:[%s2164_s4 + $0x8] sm:$0xff] (!%p515_p3)  ;;  %v853_v8 = vld [vmem:[%s2164_s4 + $0x10] sm:$0xff] (!%p515_p3)  ;;  %v649_v41 = vunpack.c.0.s8 (!%p515_p3), %v648_v38  ;;  %vm1298_vm10 = vcmask (!%p515_p3), 1045509   ;;  %vm1300_vm11 = vcmask (!%p515_p3), 1046534   ;;  %vm1302_vm12 = vcmask (!%p515_p3), 1047559  }
   0xe   : > { %v855_v6 = vpack.c.bf16 (!%p515_p3), %v852_v4, %v851_v3  ;;  %v854_v9 = vld [vmem:[%s2164_s4 + $0x18] sm:$0xff] (!%p515_p3) }
   0xf   : > { %s2171_s21 = smov (!%p590_p4, %s1777_s21), 1  ;;  %v856_v12 = vpack.c.bf16 %v854_v9, %v853_v8  ;;  %v1975_v43 = vsub.s32 %v649_v41, %v651_v40 }
  0x10   : > { %s1656_s28 = sshll.u32 %s2171_s21, 6  ;;  %1690 = vmatpush3.bf16.msra.mxu1 %v855_v6  ;;  %s1924_s29 = sshll.u32 %s2171_s21, 3 }
  0x11   : > { %s605_s17 = scalar_lea.vmem %s2147_s2, %s1656_s28  ;;  %1691 = vmatprep.subr.bf16.mxu1 %v1787_v2  ;;  %s593_s25 = scalar_lea.vmem %s2165_s20, %s1924_s29 }
  0x12   : > { %v743_v13 = vld [vmem:[%s605_s17] sm:$0xff]  ;;  %v744_v14 = vld [vmem:[%s605_s17 + $0x8] sm:$0xff]  ;;  %v745_v15 = vld [vmem:[%s605_s17 + $0x10] sm:$0xff]  ;;  %s596_s4 = scalar_lea.vmem %s2146_s1, %s2171_s21  ;;  %s610_s27 = scalar_lea.vmem %s2148_s3, %s1924_s29 }
  0x13   : > { %v751_v16 = vpack.c.bf16 %v744_v14, %v743_v13  ;;  %v746_v17 = vld [vmem:[%s605_s17 + $0x18] sm:$0xff]  ;;  %v747_v18 = vld [vmem:[%s605_s17 + $0x20] sm:$0xff]  ;;  %v748_v19 = vld [vmem:[%s605_s17 + $0x28] sm:$0xff] }
  0x14   : > { %v752_v20 = vpack.c.bf16 %v746_v17, %v745_v15  ;;  %v753_v21 = vpack.c.bf16 %v748_v19, %v747_v18  ;;  %1692 = vmatpush3.bf16.msra.mxu1 %v856_v12  ;;  %v1636_v22 = vld [vmem:[%s596_s4] ss:$0 sm:$0xff]  ;;  %v749_v25 = vld [vmem:[%s605_s17 + $0x30] sm:$0xff]  ;;  %v750_v26 = vld [vmem:[%s605_s17 + $0x38] sm:$0xff]  ;;  %s617_s17 = scalar_lea.vmem %s2160_s15, %s1924_s29 }
  0x15   : > { %1681 = vmatprep.mubr.msk.bf16.mxu0 %vm764_vm2, %v751_v16  ;;  %v631_v23 = vld [vmem:[%s593_s25] sm:$0xff]  ;;  %1697 = vmatprep.subr.bf16.mxu1 %v1787_v2  ;;  %v754_v28 = vpack.c.bf16 %v750_v26, %v749_v25  ;;  %s1657_s25 = sshll.u32 %s2171_s21, 5 }
  0x16   : > { %1682 = vmatmul.mubr.msk.bf16.vlgmr.msra.gmra.mrb[0].mxu0 %vm764_vm2, %v752_v20  ;;  %v1941_v24 = vadd.f32 %v1636_v22, %v631_v23  ;;  %v642_v39 = vld [vmem:[%s610_s27] sm:$0xff]  ;;  %s2060_s4 = scalar_lea.vmem %s2161_s16, %s1657_s25 }
  0x17   : > { %1685 = vmatprep.mubr.msk.bf16.mxu0 %vm764_vm2, %v753_v21  ;;  %1706 = vmatpush3.bf16.msra.mxu0 %v960_v11  ;;  %v646_v42 = vcombine.high %v642_v39, %v642_v39  ;;  %v653_v44 = vrot.slane %v642_v39, %v1975_v43  ;;  %v1637_v11 = vld [vmem:[%s2159_s14] ss:$0 sm:$0xff] }
  0x18   : > { %v1946_v27 = vpack.c.bf16 %v1941_v24, %v1941_v24 }
  0x19   : > { %v660_v46 = vrot.slane %v646_v42, %v1975_v43  ;;  %v661_v47 = vcombine.high %v653_v44, %v653_v44  ;;  %v669_v48 = vrot.slane %v653_v44, %v1975_v43 }
  0x1a   : > { %1694 = vmatmul.mubr.msk.bf16.vlgmr.msra.gmra.mrb[0].mxu1 %vm864_vm3, %v1946_v27 }
  0x1b   : > { %1701 = vmatprep.mubr.msk.bf16.mxu1 %vm1788_vm1, %v1787_v2  ;;  %1698 = vmatpush3.bf16.msra.mxu1 %v913_v31  ;;  %v662_v49 = vcombine.high %v660_v46, %v660_v46  ;;  %v698_v50 = vrot.slane %v669_v48, %v1978_v45  ;;  %v683_v51 = vrot.slane %v661_v47, %v1975_v43 }
  0x1c   : > { %1699 = vmatprep.subr.bf16.mxu1 %v1787_v2  ;;  %v691_v52 = vcombine.high %v669_v48, %v669_v48  ;;  %v676_v53 = vrot.slane %v660_v46, %v1975_v43 }
  0x1d   : > { %v735_v54 = vmul.f32 %v698_v50, %v642_v39  ;;  %v702_v55 = vrot.slane %v683_v51, %v1978_v45  ;;  %v690_v57 = vrot.slane %v662_v49, %v1975_v43  ;;  %v693_v58 = vcombine.high %v683_v51, %v683_v51 }
  0x1e   : > { %1686 = vmatmul.mubr.msk.bf16.gmra.mrb[4].mxu0 %vm764_vm2, %v754_v28  ;;  %v706_v56 = vrot.slane %v691_v52, %v1978_v45  ;;  %v714_v61 = vrot.slane %v676_v53, %v1978_v45  ;;  %v692_v62 = vcombine.high %v676_v53, %v676_v53 }
  0x1f   : > { %1700 = vmatpush3.bf16.msra.mxu1 %v914_v34  ;;  %1155 = vperm.xlu0 %1758, %v735_v54   ;;  %v736_v59 = vmul.f32 %v702_v55, %v642_v39  ;;  %v710_v63 = vrot.slane %v693_v58, %v1978_v45  ;;  %v718_v0 = vrot.slane %v690_v57, %v1978_v45 }
  0x20   : > { %1715 = vmatprep.subr.bf16.mxu1 %v1787_v2  ;;  %v737_v60 = vmul.f32 %v706_v56, %v642_v39  ;;  %v694_v1 = vcombine.high %v690_v57, %v690_v57  ;;  %v739_v4 = vmul.f32 %v714_v61, %v642_v39  ;;  %v722_v5 = vrot.slane %v692_v62, %v1978_v45 }
  0x21   : > { %v738_v3 = vmul.f32 %v710_v63, %v642_v39  ;;  %v740_v6 = vmul.f32 %v718_v0, %v642_v39 }
  0x22   : > { %1702 = vmatmul.mubr.msk.bf16.vlgmr.msra.gmra.mrb[4].mxu1 %vm864_vm3, %v1946_v27  ;;  %1165 = vperm.xlu1 %1759, %v737_v60   ;;  %v726_v7 = vrot.slane %v694_v1, %v1978_v45  ;;  %v741_v8 = vmul.f32 %v722_v5, %v642_v39 }
  0x23   : > { %1717 = vmatprep.mubr.msk.bf16.mxu1 %vm1788_vm1, %v1787_v2  ;;  %1160 = vperm.xlu0 %1758, %v736_v59  }
  0x24   : > { %v742_v9 = vmul.f32 %v726_v7, %v642_v39 }
  0x26   : > { %1170 = vperm.xlu1 %1759, %v738_v3  }
  0x27   : > { %1175 = vperm.xlu0 %1758, %v739_v4  }
  0x2a   : > { %1180 = vperm.xlu1 %1759, %v740_v6  }
  0x2b   : > { %1185 = vperm.xlu0 %1758, %v741_v8  }
  0x2e   : > { %1190 = vperm.xlu1 %1759, %v742_v9  }
  0x2f   : > { %1398 = vperm.xlu0 %1758, %v642_v39  }
  0xe9   : > { %v1683_v10 = vpop.f32.mrb[0].mxu0 }
  0xea   : > { %v815_v12 = vpop.f32.mrb[1].mxu0  ;;  %v2002_v19 = vadd.f32 %v1683_v10, %v1637_v11 }
  0xeb   : > { %v1684_v13 = vpop.f32.mrb[2].mxu0  ;;  %v1998_v16 = vadd.f32 %v1637_v11, %v815_v12 }
  0xec   : > { %v1996_v14 = vadd.f32 %v1684_v13, %v1637_v11  ;;  %v818_v15 = vpop.f32.mrb[3].mxu0  ;;  %v1156_v13 = vpop.permute.xlu0 %1155 }
  0xed   : > { %v2000_v17 = vadd.f32 %v1637_v11, %v818_v15  ;;  %v902_v18 = vpop.f32.mrb[0].mxu1  ;;  %v1166_v15 = vpop.permute.xlu1 %1165 }
  0xee   : > { %v1695_v20 = vpop.f32.mrb[1].mxu1  ;;  %v847_v23 = vpack.c.bf16 %v1996_v14, %v2002_v19  ;;  %v903_v38 = vadd.f32 %v1642_v37, %v902_v18 }
  0xef   : > { %v846_v21 = vpack.c.bf16 %v2000_v17, %v1998_v16  ;;  %v905_v22 = vpop.f32.mrb[2].mxu1 }
  0xf0   : > { %v1696_v25 = vpop.f32.mrb[3].mxu1  ;;  %v1047_v39 = vrot.slane %v903_v38, %v1975_v43  ;;  %v1040_v42 = vcombine.high %v903_v38, %v903_v38 }
  0xf1   : > { %v1687_v26 = vpop.f32.mrb[4].mxu0  ;;  %1707 = vmatprep.mubr.msk.bf16.mxu0 %vm961_vm4, %v846_v21 }
  0xf2   : > { %v831_v28 = vpop.f32.mrb[5].mxu0  ;;  %1708 = vmatmul.mubr.msk.bf16.vlgmr.msra.gmra.mrb[8].mxu0 %vm961_vm4, %v847_v23  ;;  %v2016_v34 = vadd.f32 %v1687_v26, %v1637_v11  ;;  %v1055_v40 = vcombine.high %v1047_v39, %v1047_v39  ;;  %v1063_v41 = vrot.slane %v1047_v39, %v1975_v43  ;;  %v1054_v47 = vrot.slane %v1040_v42, %v1975_v43  ;;  %v1161_v23 = vpop.permute.xlu0 %1160 }
  0xf3   : > { %v1688_v29 = vpop.f32.mrb[6].mxu0  ;;  %v2012_v32 = vadd.f32 %v1637_v11, %v831_v28 }
  0xf4   : > { %v2010_v30 = vadd.f32 %v1688_v29, %v1637_v11  ;;  %v834_v31 = vpop.f32.mrb[7].mxu0  ;;  %v1077_v44 = vrot.slane %v1055_v40, %v1975_v43  ;;  %v1085_v46 = vcombine.high %v1063_v41, %v1063_v41  ;;  %v1092_v51 = vrot.slane %v1063_v41, %v1978_v45  ;;  %v1171_v29 = vpop.permute.xlu1 %1170 }
  0xf5   : > { %v2014_v33 = vadd.f32 %v1637_v11, %v834_v31  ;;  %v952_v50 = vpop.f32.mrb[4].mxu1  ;;  %v1070_v52 = vrot.slane %v1054_v47, %v1975_v43  ;;  %v1056_v59 = vcombine.high %v1054_v47, %v1054_v47  ;;  %v1271_v11 = vld [vmem:[%s2154_s9] sm:$0xff] }
  0xf6   : > { %v849_v36 = vpack.c.bf16 %v2010_v30, %v2016_v34  ;;  %v1100_v48 = vrot.slane %v1085_v46, %v1978_v45  ;;  %v1087_v49 = vcombine.high %v1077_v44, %v1077_v44  ;;  %v1703_v55 = vpop.f32.mrb[5].mxu1  ;;  %v1129_v56 = vadd.f32 %v1092_v51, %v952_v50 }
  0xf7   : > { %v848_v35 = vpack.c.bf16 %v2014_v33, %v2012_v32  ;;  %v1096_v57 = vrot.slane %v1077_v44, %v1978_v45  ;;  %v955_v58 = vpop.f32.mrb[6].mxu1  ;;  %v1086_v63 = vcombine.high %v1070_v52, %v1070_v52  ;;  %v1084_v1 = vrot.slane %v1056_v59, %v1975_v43  ;;  %v1272_v43 = vld [vmem:[%s2154_s9 + $0x8] sm:$0xff] }
  0xf8   : > { %v1131_v53 = vadd.f32 %v1100_v48, %v952_v50  ;;  %v1104_v54 = vrot.slane %v1087_v49, %v1978_v45  ;;  %v1704_v61 = vpop.f32.mrb[7].mxu1  ;;  %v1108_v4 = vrot.slane %v1070_v52, %v1978_v45  ;;  %v1273_v12 = vpack.c.bf16 %v1272_v43, %v1271_v11 }
  0xf9   : > { %1711 = vmatprep.mubr.msk.bf16.mxu0 %vm961_vm4, %v848_v35  ;;  %v1130_v62 = vadd.f32 %v1096_v57, %v952_v50  ;;  %v1116_v0 = vrot.slane %v1086_v63, %v1978_v45  ;;  %v1088_v5 = vcombine.high %v1084_v1, %v1084_v1  ;;  %v1112_v9 = vrot.slane %v1084_v1, %v1978_v45  ;;  %v2066_v57 = vpop.permute.xlu1 %1180 }
  0xfa   : > { %1712 = vmatmul.mubr.msk.bf16.gmra.mrb[12].mxu0 %vm961_vm4, %v849_v36  ;;  %v1132_v60 = vadd.f32 %v1104_v54, %v952_v50  ;;  %v1133_v6 = vadd.f32 %v1108_v4, %v952_v50  ;;  %1716 = vmatpush3.bf16.msra.mxu1 %v1273_v12 }
  0xfb   : > { %v2038_v3 = vadd.f32 %v1116_v0, %v952_v50  ;;  %v1120_v7 = vrot.slane %v1088_v5, %v1978_v45  ;;  %v2045_v10 = vadd.f32 %v1112_v9, %v952_v50  ;;  %1721 = vmatprep.subr.bf16.mxu1 %v1787_v2 }
  0xfd   : > { %v2042_v8 = vadd.f32 %v1120_v7, %v952_v50  ;;  %v1176_v50 = vpop.permute.xlu0 %1175 }
 0x1c5   : > { %v1709_v18 = vpop.f32.mrb[8].mxu0 }
 0x1c6   : > { %v1139_v20 = vadd.f32 %v1709_v18, %v1131_v53  ;;  %v1008_v45 = vpop.f32.mrb[9].mxu0  ;;  %v1186_v18 = vpop.permute.xlu0 %1185 }
 0x1c7   : > { %v1137_v21 = vadd.f32 %v1129_v56, %v1008_v45  ;;  %v1710_v22 = vpop.f32.mrb[10].mxu0 }
 0x1c8   : > { %v1147_v25 = vmax.f32 %v1139_v20, 0.0  ;;  %v1140_v26 = vadd.f32 %v1710_v22, %v1132_v60  ;;  %v1011_v28 = vpop.f32.mrb[11].mxu0 }
 0x1c9   : > { %v1145_v31 = vmax.f32 %v1137_v21, 0.0  ;;  %v1138_v35 = vadd.f32 %v1130_v62, %v1011_v28 }
 0x1ca   : > { %v1195_v36 = vmul.f32 %v1166_v15, %v1147_v25  ;;  %v1148_v37 = vmax.f32 %v1140_v26, 0.0 }
 0x1cb   : > { %v1193_v38 = vmul.f32 %v1156_v13, %v1145_v31  ;;  %v1146_v39 = vmax.f32 %v1138_v35, 0.0 }
 0x1cc   : > { %v1215_v40 = vsel %vm961_vm4, %v1195_v36, 0.0  ;;  %v1436_v41 = vadd.f32 %v1195_v36, %v2002_v19  ;;  %v1196_v42 = vmul.f32 %v1171_v29, %v1148_v37 }
 0x1cd   : > { %v1216_v44 = vrot.slane %v1215_v40, 4  ;;  %v1201_v46 = vsel %vm961_vm4, %v1193_v38, 0.0  ;;  %v1434_v47 = vadd.f32 %v1193_v38, %v1998_v16  ;;  %v1194_v48 = vmul.f32 %v1161_v23, %v1146_v39  ;;  %v1713_v49 = vpop.f32.mrb[12].mxu0  ;;  %v1191_v23 = vpop.permute.xlu1 %1190 }
 0x1ce   : > { %v1444_v51 = vpack.c.bf16 %v1436_v41, %v1436_v41  ;;  %v1202_v52 = vrot.slane %v1201_v46, 4  ;;  %v1222_v19 = vsel %vm961_vm4, %v1196_v42, 0.0  ;;  %v1437_v53 = vadd.f32 %v1196_v42, %v1996_v14  ;;  %v1024_v54 = vpop.f32.mrb[13].mxu0 }
 0x1cf   : > { %v1217_v55 = vadd.f32 %v1216_v44, %v1215_v40  ;;  %v1442_v56 = vpack.c.bf16 %v1434_v47, %v1434_v47  ;;  %v1223_v58 = vrot.slane %v1222_v19, 4  ;;  %v1208_v59 = vsel %vm961_vm4, %v1194_v48, 0.0  ;;  %v1714_v16 = vpop.f32.mrb[14].mxu0 }
 0x1d0   : > { %1453 = vst.msk [vmem:[%s2060_s4 + $0x8] sm:$0xf] %vm1450_vm5, %v1444_v51  ;;  %v1203_v60 = vadd.f32 %v1202_v52, %v1201_v46  ;;  %v1445_v61 = vpack.c.bf16 %v1437_v53, %v1437_v53  ;;  %v1209_v62 = vrot.slane %v1208_v59, 4  ;;  %v1435_v63 = vadd.f32 %v1194_v48, %v2000_v17  ;;  %v1027_v0 = vpop.f32.mrb[15].mxu0 }
 0x1d1   : > { %v1218_v1 = vrot.slane %v1217_v55, 2  ;;  %1451 = vst.msk [vmem:[%s2060_s4] sm:$0xf] %vm1450_vm5, %v1442_v56  ;;  %v1224_v14 = vadd.f32 %v1223_v58, %v1222_v19  ;;  %v1143_v4 = vadd.f32 %v1713_v49, %v2038_v3  ;;  %v1141_v5 = vadd.f32 %v1133_v6, %v1024_v54 }
 0x1d2   : > { %v1204_v7 = vrot.slane %v1203_v60, 2  ;;  %1454 = vst.msk [vmem:[%s2060_s4 + $0xc] sm:$0xf] %vm1450_vm5, %v1445_v61  ;;  %v1210_v9 = vadd.f32 %v1209_v62, %v1208_v59  ;;  %v1443_v11 = vpack.c.bf16 %v1435_v63, %v1435_v63  ;;  %v1144_v43 = vadd.f32 %v1714_v16, %v2042_v8 }
 0x1d3   : > { %v1219_v12 = vadd.f32 %v1218_v1, %v1217_v55  ;;  %v1225_v13 = vrot.slane %v1224_v14, 2  ;;  %v1151_v15 = vmax.f32 %v1143_v4, 0.0  ;;  %v1149_v17 = vmax.f32 %v1141_v5, 0.0 }
 0x1d4   : > { %v1205_v20 = vadd.f32 %v1204_v7, %v1203_v60  ;;  %v1211_v45 = vrot.slane %v1210_v9, 2  ;;  %1452 = vst.msk [vmem:[%s2060_s4 + $0x4] sm:$0xf] %vm1450_vm5, %v1443_v11  ;;  %v1152_v21 = vmax.f32 %v1144_v43, 0.0  ;;  %v1142_v3 = vadd.f32 %v2045_v10, %v1027_v0 }
 0x1d5   : > { %v1220_v6 = vrot.slane %v1219_v12, 1  ;;  %v1226_v22 = vadd.f32 %v1225_v13, %v1224_v14  ;;  %v1199_v25 = vmul.f32 %v1186_v18, %v1151_v15  ;;  %v1197_v26 = vmul.f32 %v1176_v50, %v1149_v17 }
 0x1d6   : > { %v1206_v28 = vrot.slane %v1205_v20, 1  ;;  %v1212_v29 = vadd.f32 %v1211_v45, %v1210_v9  ;;  %v1200_v8 = vmul.f32 %v1191_v23, %v1152_v21  ;;  %v1150_v31 = vmax.f32 %v1142_v3, 0.0 }
 0x1d7   : > { %v1221_v35 = vadd.f32 %v1220_v6, %v1219_v12  ;;  %v1227_v36 = vrot.slane %v1226_v22, 1  ;;  %v1243_v37 = vsel %vm961_vm4, %v1199_v25, 0.0  ;;  %v1440_v38 = vadd.f32 %v1199_v25, %v2016_v34 }
 0x1d8   : > { %v1207_v39 = vadd.f32 %v1206_v28, %v1205_v20  ;;  %v1213_v40 = vrot.slane %v1212_v29, 1  ;;  %v1244_v41 = vrot.slane %v1243_v37, 4  ;;  %v1229_v10 = vsel %vm961_vm4, %v1197_v26, 0.0 }
 0x1d9   : > { %v1265_v42 = vpack.c.bf16 %v1221_v35, %v1221_v35  ;;  %v1228_v44 = vadd.f32 %v1227_v36, %v1226_v22  ;;  %v1448_v46 = vpack.c.bf16 %v1440_v38, %v1440_v38  ;;  %v1230_v47 = vrot.slane %v1229_v10, 4  ;;  %v1257_v36 = vld [vmem:[%s2153_s8] sm:$0xff] }
 0x1da   : > { %v1263_v48 = vpack.c.bf16 %v1207_v39, %v1207_v39  ;;  %v1214_v49 = vadd.f32 %v1213_v40, %v1212_v29  ;;  %v1245_v50 = vadd.f32 %v1244_v41, %v1243_v37  ;;  %v1438_v51 = vadd.f32 %v1197_v26, %v2012_v32  ;;  %v1258_v37 = vld [vmem:[%s2153_s8 + $0x8] sm:$0xff] }
 0x1db   : > { %v1266_v52 = vpack.c.bf16 %v1228_v44, %v1228_v44  ;;  %1457 = vst.msk [vmem:[%s2060_s4 + $0x18] sm:$0xf] %vm1450_vm5, %v1448_v46  ;;  %v1231_v34 = vadd.f32 %v1230_v47, %v1229_v10  ;;  %v1250_v19 = vsel %vm961_vm4, %v1200_v8, 0.0  ;;  %v1441_v59 = vadd.f32 %v1200_v8, %v2010_v30  ;;  %v1259_v44 = vld [vmem:[%s2153_s8 + $0x10] sm:$0xff]  ;;  %v1260_v46 = vld [vmem:[%s2153_s8 + $0x18] sm:$0xff] }
 0x1dc   : > { %v1264_v53 = vpack.c.bf16 %v1214_v49, %v1214_v49  ;;  %v1246_v54 = vrot.slane %v1245_v50, 2  ;;  %v1446_v55 = vpack.c.bf16 %v1438_v51, %v1438_v51  ;;  %v1251_v58 = vrot.slane %v1250_v19, 4 }
 0x1dd   : > { %v1232_v56 = vrot.slane %v1231_v34, 2  ;;  %v1284_v16 = vunpack.c.l.b16 %v1265_v42  ;;  %v1282_v32 = vunpack.c.l.b16 %v1263_v48  ;;  %v1198_v61 = vmul.f32 %v2066_v57, %v1150_v31 }
 0x1de   : > { %v1283_v60 = vunpack.c.l.b16 %v1264_v53  ;;  %1455 = vst.msk [vmem:[%s2060_s4 + $0x10] sm:$0xf] %vm1450_vm5, %v1446_v55  ;;  %v1285_v62 = vunpack.c.l.b16 %v1266_v52  ;;  %v1252_v0 = vadd.f32 %v1251_v58, %v1250_v19  ;;  %v1449_v1 = vpack.c.bf16 %v1441_v59, %v1441_v59 }
 0x1df   : > { %v1233_v63 = vadd.f32 %v1232_v56, %v1231_v34  ;;  %v1247_v4 = vadd.f32 %v1246_v54, %v1245_v50  ;;  %v1236_v5 = vsel %vm961_vm4, %v1198_v61, 0.0  ;;  %v1439_v30 = vadd.f32 %v1198_v61, %v2014_v33  ;;  %v1651_v34 = vld [vmem:[%s2155_s10] ss:$0 sm:$0xff] }
 0x1e0   : > { %v1291_v14 = vsel %vm1290_vm6, %v1283_v60, %v1282_v32  ;;  %v1253_v11 = vrot.slane %v1252_v0, 2  ;;  %1458 = vst.msk [vmem:[%s2060_s4 + $0x1c] sm:$0xf] %vm1450_vm5, %v1449_v1  ;;  %v1237_v43 = vrot.slane %v1236_v5, 4  ;;  %v1261_v10 = vpack.c.bf16 %v1258_v37, %v1257_v36 }
 0x1e1   : > { %v1293_v7 = vsel %vm1292_vm7, %v1284_v16, %v1291_v14  ;;  %v1234_v9 = vrot.slane %v1233_v63, 1  ;;  %v1447_v12 = vpack.c.bf16 %v1439_v30, %v1439_v30  ;;  %v1248_v18 = vrot.slane %v1247_v4, 1  ;;  %v1653_v30 = vld [vmem:[%s2157_s12] ss:$0 sm:$0xff] }
 0x1e2   : > { %v1295_v57 = vsel %vm1294_vm8, %v1285_v62, %v1293_v7  ;;  %v1254_v15 = vadd.f32 %v1253_v11, %v1252_v0  ;;  %v1238_v17 = vadd.f32 %v1237_v43, %v1236_v5  ;;  %v1262_v47 = vpack.c.bf16 %v1260_v46, %v1259_v44 }
 0x1e3   : > { %v1235_v13 = vadd.f32 %v1234_v9, %v1233_v63  ;;  %1456 = vst.msk [vmem:[%s2060_s4 + $0x14] sm:$0xf] %vm1450_vm5, %v1447_v12  ;;  %v1249_v6 = vadd.f32 %v1248_v18, %v1247_v4 }
 0x1e4   : > { %v1255_v45 = vrot.slane %v1254_v15, 1  ;;  %v1239_v21 = vrot.slane %v1238_v17, 2 }
 0x1e5   : > { %v1267_v20 = vpack.c.bf16 %v1235_v13, %v1235_v13  ;;  %v1269_v28 = vpack.c.bf16 %v1249_v6, %v1249_v6 }
 0x1e6   : > { %v1240_v3 = vadd.f32 %v1239_v21, %v1238_v17  ;;  %v1256_v23 = vadd.f32 %v1255_v45, %v1254_v15 }
 0x1e7   : > { %v1286_v33 = vunpack.c.l.b16 %v1267_v20  ;;  %v1288_v35 = vunpack.c.l.b16 %v1269_v28 }
 0x1e8   : > { %v1241_v25 = vrot.slane %v1240_v3, 1  ;;  %v1270_v29 = vpack.c.bf16 %v1256_v23, %v1256_v23 }
 0x1e9   : > { %v1297_v22 = vsel %vm1296_vm9, %v1286_v33, %v1295_v57 }
 0x1ea   : > { %v1242_v26 = vadd.f32 %v1241_v25, %v1240_v3  ;;  %v1289_v38 = vunpack.c.l.b16 %v1270_v29 }
 0x1ec   : > { %v1268_v8 = vpack.c.bf16 %v1242_v26, %v1242_v26 }
 0x1ee   : > { %v1287_v31 = vunpack.c.l.b16 %v1268_v8 }
 0x1f0   : > { %v1299_v39 = vsel %vm1298_vm10, %v1287_v31, %v1297_v22 }
 0x1f1   : > { %v1301_v40 = vsel %vm1300_vm11, %v1288_v35, %v1299_v39 }
 0x1f2   : > { %v1303_v41 = vsel %vm1302_vm12, %v1289_v38, %v1301_v40 }
 0x1f3   : > { %v1304_v42 = vpack.c.b16 %v1303_v41, %v1303_v41 }
 0x1f5   : > { %1718 = vmatmul.mubr.msk.bf16.vlgmr.msra.gmra.mrb[8].mxu1 %vm961_vm4, %v1304_v42 }
 0x1f6   : > { %1722 = vmatpush3.bf16.msra.mxu1 %v1261_v10  ;;  %1725 = vmatprep.mubr.msk.bf16.mxu1 %vm1788_vm1, %v1787_v2 }
 0x1f7   : > { %1723 = vmatprep.subr.bf16.mxu1 %v1787_v2  ;;  %v1399_v2 = vpop.permute.xlu0 %1398 }
 0x1fa   : > { %1724 = vmatpush3.bf16.msra.mxu1 %v1262_v47 }
 0x1fd   : > { %1726 = vmatmul.mubr.msk.bf16.vlgmr.msra.gmra.mrb[12].mxu1 %vm864_vm3, %v1946_v27 }
 0x2c8   : > { %v1342_v48 = vpop.f32.mrb[8].mxu1 }
 0x2c9   : > { %v1719_v49 = vpop.f32.mrb[9].mxu1 }
 0x2ca   : > { %v1345_v50 = vpop.f32.mrb[10].mxu1 }
 0x2cb   : > { %v1720_v51 = vpop.f32.mrb[11].mxu1 }
 0x2d0   : > { %v1382_v52 = vpop.f32.mrb[12].mxu1 }
 0x2d1   : > { %v1383_v19 = vadd.f32 %v1382_v52, %v1342_v48  ;;  %v1727_v53 = vpop.f32.mrb[13].mxu1 }
 0x2d2   : > { %v1385_v54 = vpop.f32.mrb[14].mxu1 }
 0x2d3   : > { %v1395_v55 = vadd.f32 %v1651_v34, %v1383_v19  ;;  %v1728_v56 = vpop.f32.mrb[15].mxu1 }
 0x2d5   : > { %v1396_v58 = vmax.f32 %v1395_v55, 0.0 }
 0x2d7   : > { %v1401_v59 = vmul.f32 %v1399_v2, %v1396_v58 }
 0x2d9   : > { %v1402_v16 = vadd.f32 %v1401_v59, %v1941_v24  ;;  %v1652_v24 = vld [vmem:[%s2156_s11] ss:$0 sm:$0xff] }
 0x2db   : > { %v1403_v27 = vsel %vm864_vm3, %v1402_v16, 0.0 }
 0x2dc   : > { %1404 = vadd.xlane.f32.xlu1 %v1403_v27 }
 0x369   : > { %v1405_v32 = vpop.xlane.xlu1 %1404 }
 0x36a   : > { %v1407_v60 = vmul.f32 0.03125, %v1405_v32 }
 0x36c   : > { %v1408_v61 = vsub.f32 %v1402_v16, %v1407_v60 }
 0x36e   : > { %v1409_v62 = vmul.f32 %v1408_v61, %v1408_v61 }
 0x370   : > { %v1410_v63 = vsel %vm864_vm3, %v1409_v62, 0.0 }
 0x371   : > { %1411 = vadd.xlane.f32.xlu0 %v1410_v63 }
 0x3fe   : > { %v1412_v0 = vpop.xlane.xlu0 %1411 }
 0x3ff   : > { %v1413_v1 = vmul.f32 0.03125, %v1412_v0 }
 0x401   : > { %v1414_v14 = vadd.f32 1e-05, %v1413_v1 }
 0x403   : > { %1761 = vrsqrt.f32 %v1414_v14 }
 0x40d   : > { %v1762_v4 = vpop.eup %1761 }
 0x40e   : > { %v1416_v5 = vmul.f32 %v1762_v4, %v1408_v61 }
 0x410   : > { %v1424_v7 = vmul.f32 %v1652_v24, %v1416_v5 }
 0x412   : > { %v1432_v9 = vadd.f32 %v1653_v30, %v1424_v7 }
 0x414   : > { %1433 = vst.msk [vmem:[%s617_s17] sm:$0xff] %vm864_vm3, %v1432_v9 }
 0x415 PF: > { %s27_s23 = sadd.s32 1, %s1785_s23   ;;  %s2166_s21 = smov %s1781_s22 }
 0x416   : > { %p24_p5 = scmp.ge.s32.totalorder %s27_s23, 4   ;;  %s2167_s22 = smov %s2169_s24 }
 0x418   :  { %26 = sbr.rel (!%p24_p5) target bundleno = 3 (0x3), region = 133 }

// kernel: dense_gnn2_forward.10
= control target key start
LH: loop header
LB: loop body
LE: loop exit
PB: predicated region body
PF: predicated region fallthrough
CT: control target
= control target key end

     0   :  { %s1922_s21 = smov 0   ;;  %s1924_s22 = smov 0   ;;  %s2190_s0 = inlined_call_operand.vmem [shape: f32[2,8,32], index: 0, kind: input, shape index: {}]   ;;  %s2191_s1 = inlined_call_operand.vmem [shape: f32[2,1,32], index: 1, kind: input, shape index: {}]   ;;  %s2192_s2 = inlined_call_operand.vmem [shape: bf16[2,8,8,16], index: 2, kind: input, shape index: {}]   ;;  %s2193_s3 = inlined_call_operand.vmem [shape: f32[2,8,1], index: 3, kind: input, shape index: {}]   ;;  %s2194_s4 = inlined_call_operand.vmem [shape: f32[32,16], index: 4, kind: input, shape index: {}]   ;;  %s2195_s5 = inlined_call_operand.vmem [shape: f32[32,16], index: 5, kind: input, shape index: {}]   ;;  %s2196_s6 = inlined_call_operand.vmem [shape: f32[16,16], index: 6, kind: input, shape index: {}]   ;;  %s2197_s7 = inlined_call_operand.vmem [shape: f32[1,16], index: 7, kind: input, shape index: {}]   ;;  %s2198_s8 = inlined_call_operand.vmem [shape: f32[32,32], index: 8, kind: input, shape index: {}]   ;;  %s2199_s9 = inlined_call_operand.vmem [shape: f32[16,32], index: 9, kind: input, shape index: {}]   ;;  %s2200_s10 = inlined_call_operand.vmem [shape: f32[1,32], index: 10, kind: input, shape index: {}]   ;;  %s2201_s11 = inlined_call_operand.vmem [shape: f32[1,32], index: 11, kind: input, shape index: {}]   ;;  %s2202_s12 = inlined_call_operand.vmem [shape: f32[1,32], index: 12, kind: input, shape index: {}]   ;;  %s2203_s13 = inlined_call_operand.vmem [shape: f32[16,2], index: 13, kind: input, shape index: {}]   ;;  %s2204_s14 = inlined_call_operand.vmem [shape: f32[1,2], index: 14, kind: input, shape index: {}]   ;;  %s2205_s15 = inlined_call_operand.vmem [shape: f32[2,8,32], index: 15, kind: output, shape index: {0}]   ;;  %s2206_s16 = inlined_call_operand.vmem [shape: f32[2,8,8,2], index: 16, kind: output, shape index: {1}]  }
   0x1   :  { %2207 = sst [smem:[#allocation2_spill]] %s2190_s0  ;;  %s1926_s23 = smov 0  }
   0x2   :  { %2208 = sst [smem:[#allocation3_spill]] %s2191_s1 }
   0x3   :  { %2209 = sst [smem:[#allocation4_spill]] %s2194_s4 }
   0x4   :  { %2210 = sst [smem:[#allocation5_spill]] %s2196_s6 }
   0x5 LB: > { %s39_s24 = sadd.s32 1, %s1827_s22  ;;  %p1648_p0 = scmp.ge.s32.totalorder %s1831_s23, 1  ;;  %s1831_s23 = sphi %s1926_s23, %s27_s23   ;;  %s1827_s22 = sphi %s1924_s22, %s2216_s22   ;;  %s1823_s21 = sphi %s1922_s21, %s2215_s21  }
   0x6   : > { %p41_p1 = scmp.ge.s32.totalorder %s39_s24, 2  ;;  %p514_p2 = scmp.lt.s32.totalorder %s1831_s23, 3 }
   0x8   : > { %s2218_s24 = smov (%p41_p1, %s39_s24), 0  ;;  %p515_p3 = pnand %p1648_p0, %p514_p2 }
   0x9   : > { %s2211_s4 = sld [smem:[#allocation4_spill]] (!%p515_p3)  ;;  %p590_p4 = scmp.lt.s32.totalorder (!%p515_p3), %s1823_s21, 1  ;;  %v650_v3 = vlaneseq (!%p515_p3)  ;;  %v1833_v4 = vmov (!%p515_p3), 0.0   ;;  %vm1834_vm0 = vmmov (!%p515_p3), 0   ;;  %v1835_v10 = vmov (!%p515_p3), 0   ;;  %v810_v16 = vld [vmem:[%s2195_s5] sm:$0xff] (!%p515_p3) }
   0xa   : > { %518 = sbr.rel (%p515_p3) target bundleno = 834 (0x342), region = 80  ;;  %1722 = vmatprep.subr.bf16.mxu1 (!%p515_p3), %v1833_v4  ;;  %s2212_s6 = sld [smem:[#allocation5_spill]] (!%p515_p3)  ;;  %1726 = vmatprep.mubr.msk.bf16.mxu1 (!%p515_p3), %vm1834_vm0, %v1833_v4  ;;  %v1836_v12 = vmov (!%p515_p3), 1966171168   ;;  %v811_v17 = vld [vmem:[%s2195_s5 + $0x8] sm:$0xff] (!%p515_p3)  ;;  %vm882_vm1 = vcmask (!%p515_p3), 130048  }
   0xb   : > { %1800 = vset.pattern.permute.xlu0 (!%p515_p3), %v1835_v10  ;;  %1801 = vset.pattern.permute.xlu1 (!%p515_p3), %v1835_v10  ;;  %v648_v13 = vunpack.c.l.s4 (!%p515_p3), %v1836_v12  ;;  %s2213_s1 = sld [smem:[#allocation3_spill]] (!%p515_p3)  ;;  %v651_v14 = vshrl.u32 (!%p515_p3), %v650_v3, 7  ;;  %s2214_s17 = sld [smem:[#allocation2_spill]] (!%p515_p3)  ;;  %v812_v22 = vld [vmem:[%s2195_s5 + $0x10] sm:$0xff] (!%p515_p3)  ;;  %v813_v23 = vld [vmem:[%s2195_s5 + $0x18] sm:$0xff] (!%p515_p3)  ;;  %vm765_vm2 = vcmask (!%p515_p3), 261120   ;;  %v814_v24 = vpack.c.bf16 (!%p515_p3), %v811_v17, %v810_v16 }
   0xc   : > { %v815_v30 = vpack.c.bf16 (!%p515_p3), %v813_v23, %v812_v22  ;;  %v1383_v62 = vld [vmem:[%s2203_s13] sm:$0xff] (!%p515_p3)  ;;  %v1384_v63 = vld [vmem:[%s2203_s13 + $0x8] sm:$0xff] (!%p515_p3)  ;;  %vm1211_vm3 = vcmask (!%p515_p3), 1041409   ;;  %vm1213_vm4 = vcmask (!%p515_p3), 1042434   ;;  %vm1215_vm5 = vcmask (!%p515_p3), 1043459  }
   0xd   : > { %v649_v18 = vunpack.c.0.s8 (!%p515_p3), %v648_v13  ;;  %v2017_v32 = vsub.s32 (!%p515_p3), 0, %v651_v14  ;;  %vm1217_vm6 = vcmask (!%p515_p3), 1044484   ;;  %vm1219_vm7 = vcmask (!%p515_p3), 1045509  }
   0xe   : > { %vm1221_vm8 = vcmask (!%p515_p3), 1046534   ;;  %vm1223_vm9 = vcmask (!%p515_p3), 1047559   ;;  %vm1470_vm10 = vcmask (!%p515_p3), 15360  }
   0xf   : > { %v752_v0 = vld [vmem:[%s2211_s4] sm:$0xff] (!%p515_p3)  ;;  %v753_v1 = vld [vmem:[%s2211_s4 + $0x8] sm:$0xff] (!%p515_p3)  ;;  %v754_v2 = vld [vmem:[%s2211_s4 + $0x10] sm:$0xff] (!%p515_p3)  ;;  %v2002_v26 = vsub.s32 (!%p515_p3), %v649_v18, %v651_v14 }
  0x10   : > { %v756_v5 = vpack.c.bf16 (!%p515_p3), %v753_v1, %v752_v0  ;;  %v755_v6 = vld [vmem:[%s2211_s4 + $0x18] sm:$0xff] (!%p515_p3)  ;;  %v859_v7 = vld [vmem:[%s2212_s6] sm:$0xff] (!%p515_p3)  ;;  %v860_v8 = vld [vmem:[%s2212_s6 + $0x8] sm:$0xff] (!%p515_p3)  ;;  %v1385_v0 = vpack.c.bf16 (!%p515_p3), %v1384_v63, %v1383_v62 }
  0x11   : > { %v861_v9 = vpack.c.bf16 %v860_v8, %v859_v7  ;;  %s2220_s21 = smov (!%p590_p4, %s1823_s21), 1  ;;  %v757_v11 = vpack.c.bf16 %v755_v6, %v754_v2  ;;  %v1192_v1 = vld [vmem:[%s2199_s9] sm:$0xff]  ;;  %v1193_v2 = vld [vmem:[%s2199_s9 + $0x8] sm:$0xff] }
  0x12   : > { %1723 = vmatpush3.bf16.msra.mxu1 %v756_v5  ;;  %s1965_s26 = sshll.u32 %s2220_s21, 3  ;;  %s596_s29 = scalar_lea.vmem %s2213_s1, %s2220_s21  ;;  %v1194_v3 = vpack.c.bf16 %v1193_v2, %v1192_v1  ;;  %v1657_v6 = vld [vmem:[%s2197_s7] ss:$0 sm:$0xff] }
  0x13   : > { %1724 = vmatprep.subr.bf16.mxu1 %v1833_v4  ;;  %1738 = vmatprep.subr.bf16.mxu0 %v861_v9  ;;  %s593_s18 = scalar_lea.vmem %s2214_s17, %s1965_s26  ;;  %s1680_s19 = sshll.u32 %s2220_s21, 5  ;;  %v1656_v15 = vld [vmem:[%s596_s29] ss:$0 sm:$0xff] }
  0x14   : > { %1739 = vmatpush3.bf16.msra.mxu0 %v861_v9  ;;  %s1985_s1 = scalar_lea.vmem %s2192_s2, %s1680_s19  ;;  %v631_v19 = vld [vmem:[%s593_s18] sm:$0xff]  ;;  %s610_s18 = scalar_lea.vmem %s2193_s3, %s1965_s26 }
  0x15   : > { %v1987_v20 = vadd.f32 %v1656_v15, %v631_v19  ;;  %v1802_v21 = vld [vmem:[%s1985_s1] sm:$0xff]   ;;  %v1803_v25 = vld [vmem:[%s1985_s1 + $0x8] sm:$0xff]   ;;  %v1804_v28 = vld [vmem:[%s1985_s1 + $0x10] sm:$0xff]   ;;  %1762 = vmatprep.subr.bf16.mxu0 %v1385_v0  ;;  %s1681_s29 = sshll.u32 %s2220_s21, 6 }
  0x16   : > { %1725 = vmatpush3.bf16.msra.mxu1 %v757_v11  ;;  %1740 = vmatprep.mubr.msk.bf16.mxu0 %vm882_vm1, %v1802_v21  ;;  %v642_v29 = vld [vmem:[%s610_s18] sm:$0xff]  ;;  %v1805_v34 = vld [vmem:[%s1985_s1 + $0x18] sm:$0xff]  }
  0x17   : > { %1730 = vmatprep.subr.bf16.mxu1 %v1833_v4  ;;  %v2006_v27 = vpack.c.bf16 %v1987_v20, %v1987_v20  ;;  %1741 = vmatmul.mubr.msk.bf16.vlgmr.msra.gmra.mrb[0].mxu0 %vm882_vm1, %v1803_v25  ;;  %v653_v31 = vrot.slane %v642_v29, %v2002_v26  ;;  %v646_v33 = vcombine.high %v642_v29, %v642_v29  ;;  %v2064_v23 = vld [vmem:[%s1985_s1 + $0x18] sm:$0xff]   ;;  %v2070_v25 = vld [vmem:[%s1985_s1] sm:$0xff]  }
  0x18   : > { %1744 = vmatprep.mubr.msk.bf16.mxu0 %vm882_vm1, %v1804_v28  ;;  %1763 = vmatpush3.bf16.msra.mxu0 %v1385_v0 }
  0x19   : > { %1727 = vmatmul.mubr.msk.bf16.vlgmr.msra.gmra.mrb[0].mxu1 %vm765_vm2, %v2006_v27  ;;  %v661_v35 = vcombine.high %v653_v31, %v653_v31  ;;  %v669_v36 = vrot.slane %v653_v31, %v2002_v26  ;;  %v660_v37 = vrot.slane %v646_v33, %v2002_v26 }
  0x1a   : > { %1731 = vmatpush3.bf16.msra.mxu1 %v814_v24  ;;  %1734 = vmatprep.mubr.msk.bf16.mxu1 %vm1834_vm0, %v1833_v4  ;;  %v2067_v24 = vld [vmem:[%s1985_s1 + $0x10] sm:$0xff]  }
  0x1b   : > { %1732 = vmatprep.subr.bf16.mxu1 %v1833_v4  ;;  %v698_v38 = vrot.slane %v669_v36, %v2017_v32  ;;  %v683_v39 = vrot.slane %v661_v35, %v2002_v26  ;;  %v691_v40 = vcombine.high %v669_v36, %v669_v36  ;;  %v676_v41 = vrot.slane %v660_v37, %v2002_v26 }
  0x1c   : > { %v662_v42 = vcombine.high %v660_v37, %v660_v37 }
  0x1d   : > { %v735_v43 = vmul.f32 %v698_v38, %v642_v29  ;;  %v702_v44 = vrot.slane %v683_v39, %v2017_v32  ;;  %v706_v45 = vrot.slane %v691_v40, %v2017_v32  ;;  %v714_v46 = vrot.slane %v676_v41, %v2017_v32 }
  0x1e   : > { %1733 = vmatpush3.bf16.msra.mxu1 %v815_v30  ;;  %v693_v47 = vcombine.high %v683_v39, %v683_v39  ;;  %v690_v48 = vrot.slane %v662_v42, %v2002_v26  ;;  %v692_v51 = vcombine.high %v676_v41, %v676_v41  ;;  %v1696_v38 = vunpack.c.l.bf16 %v2064_v23 }
  0x1f   : > { %1748 = vmatprep.subr.bf16.mxu1 %v1833_v4  ;;  %1745 = vmatmul.mubr.msk.bf16.gmra.mrb[4].mxu0 %vm882_vm1, %v1805_v34  ;;  %v736_v49 = vmul.f32 %v702_v44, %v642_v29  ;;  %v737_v50 = vmul.f32 %v706_v45, %v642_v29  ;;  %v739_v56 = vmul.f32 %v714_v46, %v642_v29  ;;  %v1692_v40 = vunpack.c.l.bf16 %v2067_v24 }
  0x20   : > { %1076 = vperm.xlu0 %1800, %v735_v43   ;;  %v710_v52 = vrot.slane %v693_v47, %v2017_v32  ;;  %v718_v53 = vrot.slane %v690_v48, %v2017_v32  ;;  %v694_v54 = vcombine.high %v690_v48, %v690_v48  ;;  %v722_v57 = vrot.slane %v692_v51, %v2017_v32 }
  0x21   : > { %1735 = vmatmul.mubr.msk.bf16.vlgmr.msra.gmra.mrb[4].mxu1 %vm765_vm2, %v2006_v27  ;;  %1086 = vperm.xlu1 %1801, %v737_v50   ;;  %v1684_v41 = vunpack.c.l.bf16 %v2070_v25 }
  0x22   : > { %1750 = vmatprep.mubr.msk.bf16.mxu1 %vm1834_vm0, %v1833_v4  ;;  %v738_v55 = vmul.f32 %v710_v52, %v642_v29  ;;  %v740_v58 = vmul.f32 %v718_v53, %v642_v29  ;;  %v726_v59 = vrot.slane %v694_v54, %v2017_v32  ;;  %v741_v60 = vmul.f32 %v722_v57, %v642_v29 }
  0x23   : > { %1749 = vmatpush3.bf16.msra.mxu1 %v1194_v3  ;;  %v1693_v52 = vunpack.c.h.bf16 %v2067_v24 }
  0x24   : > { %1081 = vperm.xlu0 %1800, %v736_v49   ;;  %v742_v61 = vmul.f32 %v726_v59, %v642_v29  ;;  %1754 = vmatprep.subr.bf16.mxu1 %v1833_v4 }
  0x25   : > { %1091 = vperm.xlu1 %1801, %v738_v55  }
  0x28   : > { %1096 = vperm.xlu0 %1800, %v739_v56  }
  0x29   : > { %1101 = vperm.xlu1 %1801, %v740_v58  }
  0x2c   : > { %1106 = vperm.xlu0 %1800, %v741_v60  }
  0x2d   : > { %1111 = vperm.xlu1 %1801, %v742_v61  }
  0x30   : > { %1319 = vperm.xlu0 %1800, %v642_v29  }
  0x9f   : > { %v2053_v5 = vpop.permute.xlu0 %1076 }
  0xa0   : > { %v2058_v7 = vpop.permute.xlu1 %1086 }
  0xa3   : > { %v1082_v28 = vpop.permute.xlu0 %1081 }
  0xa4   : > { %v2074_v34 = vpop.permute.xlu1 %1091 }
  0xa7   : > { %v1097_v59 = vpop.permute.xlu0 %1096 }
  0xea   : > { %v1742_v8 = vpop.f32.mrb[0].mxu0 }
  0xeb   : > { %v929_v10 = vpop.f32.mrb[1].mxu0 }
  0xec   : > { %v803_v9 = vpop.f32.mrb[0].mxu1  ;;  %v1743_v13 = vpop.f32.mrb[2].mxu0 }
  0xed   : > { %v804_v11 = vadd.f32 %v1657_v6, %v803_v9  ;;  %v1728_v12 = vpop.f32.mrb[1].mxu1  ;;  %v932_v15 = vpop.f32.mrb[3].mxu0 }
  0xee   : > { %v806_v14 = vpop.f32.mrb[2].mxu1  ;;  %v1102_v12 = vpop.permute.xlu1 %1101 }
  0xef   : > { %v961_v16 = vcombine.high %v804_v11, %v804_v11  ;;  %v968_v17 = vrot.slane %v804_v11, %v2002_v26  ;;  %v1729_v18 = vpop.f32.mrb[3].mxu1 }
  0xf1   : > { %v975_v19 = vrot.slane %v961_v16, %v2002_v26  ;;  %v976_v21 = vcombine.high %v968_v17, %v968_v17  ;;  %v984_v22 = vrot.slane %v968_v17, %v2002_v26 }
  0xf2   : > { %v1746_v35 = vpop.f32.mrb[4].mxu0 }
  0xf3   : > { %v977_v29 = vcombine.high %v975_v19, %v975_v19  ;;  %v991_v30 = vrot.slane %v975_v19, %v2002_v26  ;;  %v998_v31 = vrot.slane %v976_v21, %v2002_v26  ;;  %v1006_v33 = vcombine.high %v984_v22, %v984_v22  ;;  %v945_v39 = vpop.f32.mrb[5].mxu0 }
  0xf4   : > { %v1013_v36 = vrot.slane %v984_v22, %v2017_v32  ;;  %v853_v37 = vpop.f32.mrb[4].mxu1  ;;  %v1747_v47 = vpop.f32.mrb[6].mxu0 }
  0xf5   : > { %v1008_v42 = vcombine.high %v998_v31, %v998_v31  ;;  %v1017_v43 = vrot.slane %v998_v31, %v2017_v32  ;;  %v1021_v44 = vrot.slane %v1006_v33, %v2017_v32  ;;  %v1736_v45 = vpop.f32.mrb[5].mxu1  ;;  %v1007_v46 = vcombine.high %v991_v30, %v991_v30  ;;  %v948_v51 = vpop.f32.mrb[7].mxu0 }
  0xf6   : > { %v856_v48 = vpop.f32.mrb[6].mxu1  ;;  %v1029_v49 = vrot.slane %v991_v30, %v2017_v32  ;;  %v1005_v50 = vrot.slane %v977_v29, %v2002_v26  ;;  %v1050_v53 = vadd.f32 %v1013_v36, %v853_v37  ;;  %v1107_v30 = vpop.permute.xlu0 %1106 }
  0xf7   : > { %v1025_v54 = vrot.slane %v1008_v42, %v2017_v32  ;;  %v1052_v55 = vadd.f32 %v1021_v44, %v853_v37  ;;  %v1037_v56 = vrot.slane %v1007_v46, %v2017_v32  ;;  %v1737_v57 = vpop.f32.mrb[7].mxu1  ;;  %v1051_v58 = vadd.f32 %v1017_v43, %v853_v37  ;;  %v1112_v45 = vpop.permute.xlu1 %1111 }
  0xf8   : > { %v1054_v60 = vadd.f32 %v1029_v49, %v853_v37  ;;  %v1009_v61 = vcombine.high %v1005_v50, %v1005_v50  ;;  %v1033_v62 = vrot.slane %v1005_v50, %v2017_v32  ;;  %v1058_v63 = vadd.f32 %v1050_v53, %v929_v10 }
  0xf9   : > { %v1053_v0 = vadd.f32 %v1025_v54, %v853_v37  ;;  %v1060_v1 = vadd.f32 %v1742_v8, %v1052_v55  ;;  %v1056_v26 = vadd.f32 %v1037_v56, %v853_v37  ;;  %v1059_v2 = vadd.f32 %v1051_v58, %v932_v15 }
  0xfa   : > { %v1062_v3 = vadd.f32 %v1054_v60, %v945_v39  ;;  %v1041_v6 = vrot.slane %v1009_v61, %v2017_v32  ;;  %v1055_v9 = vadd.f32 %v1033_v62, %v853_v37  ;;  %v1066_v11 = vmax.f32 %v1058_v63, 0.0 }
  0xfb   : > { %v1061_v14 = vadd.f32 %v1743_v13, %v1053_v0  ;;  %v1068_v16 = vmax.f32 %v1060_v1, 0.0  ;;  %v1064_v17 = vadd.f32 %v1746_v35, %v1056_v26  ;;  %v1067_v18 = vmax.f32 %v1059_v2, 0.0 }
  0xfc   : > { %v1070_v19 = vmax.f32 %v1062_v3, 0.0  ;;  %v1057_v21 = vadd.f32 %v1041_v6, %v853_v37  ;;  %v1063_v22 = vadd.f32 %v1055_v9, %v948_v51  ;;  %v1114_v24 = vmul.f32 %v2053_v5, %v1066_v11 }
  0xfd   : > { %v1072_v10 = vmax.f32 %v1064_v17, 0.0  ;;  %v1697_v8 = vunpack.c.h.bf16 %v2064_v23  ;;  %v1115_v29 = vmul.f32 %v1082_v28, %v1067_v18  ;;  %v1685_v15 = vunpack.c.h.bf16 %v2070_v25 }
  0xfe   : > { %v1118_v32 = vmul.f32 %v1097_v59, %v1070_v19  ;;  %v1065_v31 = vadd.f32 %v1747_v47, %v1057_v21  ;;  %v1071_v33 = vmax.f32 %v1063_v22, 0.0  ;;  %v1122_v13 = vsel %vm882_vm1, %v1114_v24, 0.0 }
  0xff   : > { %v1069_v36 = vmax.f32 %v1061_v14, 0.0  ;;  %v1120_v35 = vmul.f32 %v1107_v30, %v1072_v10  ;;  %v1123_v39 = vrot.slane %v1122_v13, 4  ;;  %v2094_v37 = vmul.f32 %v2058_v7, %v1068_v16 }
 0x100   : > { %v1150_v5 = vsel %vm882_vm1, %v1118_v32, 0.0  ;;  %v1073_v42 = vmax.f32 %v1065_v31, 0.0  ;;  %v1119_v43 = vmul.f32 %v1102_v12, %v1071_v33  ;;  %v1129_v28 = vsel %vm882_vm1, %v1115_v29, 0.0 }
 0x101   : > { %v1164_v44 = vsel %vm882_vm1, %v1120_v35, 0.0  ;;  %v1151_v46 = vrot.slane %v1150_v5, 4  ;;  %v2099_v47 = vadd.f32 %v1692_v40, %v1118_v32  ;;  %v1124_v48 = vadd.f32 %v1123_v39, %v1122_v13 }
 0x102   : > { %v1165_v49 = vrot.slane %v1164_v44, 4  ;;  %v1121_v50 = vmul.f32 %v1112_v45, %v1073_v42  ;;  %v1157_v51 = vsel %vm882_vm1, %v1119_v43, 0.0  ;;  %v2102_v53 = vadd.f32 %v1693_v52, %v1119_v43 }
 0x103   : > { %v2106_v7 = vadd.f32 %v1696_v38, %v1120_v35  ;;  %v1158_v54 = vrot.slane %v1157_v51, 4  ;;  %v1125_v55 = vrot.slane %v1124_v48, 2  ;;  %v1130_v56 = vrot.slane %v1129_v28, 4 }
 0x104   : > { %v1152_v57 = vadd.f32 %v1151_v46, %v1150_v5  ;;  %v1171_v58 = vsel %vm882_vm1, %v1121_v50, 0.0  ;;  %v2109_v59 = vadd.f32 %v1697_v8, %v1121_v50  ;;  %v1381_v40 = vpack.c.bf16 %v2102_v53, %v2099_v47 }
 0x105   : > { %v1166_v60 = vadd.f32 %v1165_v49, %v1164_v44  ;;  %v1172_v61 = vrot.slane %v1171_v58, 4  ;;  %v1159_v62 = vadd.f32 %v1158_v54, %v1157_v51  ;;  %v1126_v52 = vadd.f32 %v1125_v55, %v1124_v48 }
 0x106   : > { %v1382_v23 = vpack.c.bf16 %v2109_v59, %v2106_v7  ;;  %v1131_v38 = vadd.f32 %v1130_v56, %v1129_v28  ;;  %v1371_v63 = vadd.f32 %v1684_v41, %v1114_v24  ;;  %v1372_v0 = vadd.f32 %v1685_v15, %v1115_v29  ;;  %v1698_v41 = vld [vmem:[%s1985_s1 + $0x8] sm:$0xff]   ;;  %s626_s1 = scalar_lea.vmem %s2206_s16, %s1681_s29  ;;  %s617_s29 = scalar_lea.vmem %s2205_s15, %s1965_s26 }
 0x107   : > { %v1173_v1 = vadd.f32 %v1172_v61, %v1171_v58  ;;  %v1127_v26 = vrot.slane %v1126_v52, 1  ;;  %v1153_v2 = vrot.slane %v1152_v57, 2  ;;  %v1117_v9 = vmul.f32 %v2074_v34, %v1069_v36 }
 0x108   : > { %v1132_v3 = vrot.slane %v1131_v38, 2  ;;  %v1379_v6 = vpack.c.bf16 %v1372_v0, %v1371_v63  ;;  %v1167_v11 = vrot.slane %v1166_v60, 2  ;;  %v1160_v12 = vrot.slane %v1159_v62, 2 }
 0x109   : > { %v1128_v14 = vadd.f32 %v1127_v26, %v1126_v52  ;;  %v1136_v17 = vsel %vm882_vm1, %v2094_v37, 0.0  ;;  %v1143_v25 = vsel %vm882_vm1, %v1117_v9, 0.0  ;;  %v1174_v18 = vrot.slane %v1173_v1, 2 }
 0x10a   : > { %v1133_v16 = vadd.f32 %v1132_v3, %v1131_v38  ;;  %1764 = vmatprep.mubr.msk.bf16.mxu0 %vm882_vm1, %v1379_v6  ;;  %v1154_v19 = vadd.f32 %v1153_v2, %v1152_v57  ;;  %v1137_v22 = vrot.slane %v1136_v17, 4  ;;  %v1144_v24 = vrot.slane %v1143_v25, 4 }
 0x10b   : > { %v1168_v10 = vadd.f32 %v1167_v11, %v1166_v60  ;;  %v1161_v8 = vadd.f32 %v1160_v12, %v1159_v62  ;;  %v1688_v34 = vunpack.c.l.bf16 %v1698_v41  ;;  %v1689_v29 = vunpack.c.h.bf16 %v1698_v41  ;;  %v1178_v11 = vld [vmem:[%s2198_s8] sm:$0xff]  ;;  %v1179_v12 = vld [vmem:[%s2198_s8 + $0x8] sm:$0xff]  ;;  %v1181_v41 = vld [vmem:[%s2198_s8 + $0x18] sm:$0xff] }
 0x10c   : > { %v1134_v21 = vrot.slane %v1133_v16, 1  ;;  %v1184_v30 = vpack.c.bf16 %v1128_v14, %v1128_v14  ;;  %v1138_v32 = vadd.f32 %v1137_v22, %v1136_v17  ;;  %v1145_v31 = vadd.f32 %v1144_v24, %v1143_v25  ;;  %v1180_v25 = vld [vmem:[%s2198_s8 + $0x10] sm:$0xff] }
 0x10d   : > { %v1175_v33 = vadd.f32 %v1174_v18, %v1173_v1  ;;  %v1155_v13 = vrot.slane %v1154_v19, 1  ;;  %v1169_v5 = vrot.slane %v1168_v10, 1  ;;  %v1162_v42 = vrot.slane %v1161_v8, 1 }
 0x10e   : > { %v1135_v15 = vadd.f32 %v1134_v21, %v1133_v16  ;;  %v1139_v35 = vrot.slane %v1138_v32, 2  ;;  %v1146_v39 = vrot.slane %v1145_v31, 2  ;;  %v1373_v43 = vadd.f32 %v1688_v34, %v2094_v37 }
 0x10f   : > { %v1374_v28 = vadd.f32 %v1689_v29, %v1117_v9  ;;  %v1203_v44 = vunpack.c.l.b16 %v1184_v30  ;;  %v1176_v48 = vrot.slane %v1175_v33, 1  ;;  %v1156_v50 = vadd.f32 %v1155_v13, %v1154_v19  ;;  %v1673_v19 = vld [vmem:[%s2204_s14] ss:$0 sm:$0xff] }
 0x110   : > { %v1185_v36 = vpack.c.bf16 %v1135_v15, %v1135_v15  ;;  %v1140_v46 = vadd.f32 %v1139_v35, %v1138_v32  ;;  %v1147_v47 = vadd.f32 %v1146_v39, %v1145_v31  ;;  %v1163_v55 = vadd.f32 %v1162_v42, %v1161_v8 }
 0x111   : > { %v1380_v49 = vpack.c.bf16 %v1374_v28, %v1373_v43  ;;  %v1170_v56 = vadd.f32 %v1169_v5, %v1168_v10  ;;  %v1177_v58 = vadd.f32 %v1176_v48, %v1175_v33  ;;  %v1188_v60 = vpack.c.bf16 %v1156_v50, %v1156_v50  ;;  %v1670_v28 = vld [vmem:[%s2200_s10] ss:$0 sm:$0xff]  ;;  %v1320_v50 = vpop.permute.xlu0 %1319 }
 0x112   : > { %v1204_v45 = vunpack.c.l.b16 %v1185_v36  ;;  %v1141_v53 = vrot.slane %v1140_v46, 1  ;;  %v1148_v54 = vrot.slane %v1147_v47, 1  ;;  %v1189_v52 = vpack.c.bf16 %v1163_v55, %v1163_v55 }
 0x113   : > { %1765 = vmatmul.mubr.msk.bf16.vlgmr.msra.gmra.mrb[8].mxu0 %vm882_vm1, %v1380_v49  ;;  %v1190_v38 = vpack.c.bf16 %v1170_v56, %v1170_v56  ;;  %v1191_v1 = vpack.c.bf16 %v1177_v58, %v1177_v58  ;;  %v1207_v26 = vunpack.c.l.b16 %v1188_v60  ;;  %v1182_v59 = vpack.c.bf16 %v1179_v12, %v1178_v11 }
 0x114   : > { %v1212_v51 = vsel %vm1211_vm3, %v1204_v45, %v1203_v44  ;;  %v1142_v57 = vadd.f32 %v1141_v53, %v1140_v46  ;;  %1768 = vmatprep.mubr.msk.bf16.mxu0 %vm882_vm1, %v1381_v40  ;;  %v1149_v37 = vadd.f32 %v1148_v54, %v1147_v47  ;;  %v1208_v3 = vunpack.c.l.b16 %v1189_v52 }
 0x115   : > { %v1209_v6 = vunpack.c.l.b16 %v1190_v38  ;;  %v1210_v14 = vunpack.c.l.b16 %v1191_v1  ;;  %v1183_v18 = vpack.c.bf16 %v1181_v41, %v1180_v25 }
 0x116   : > { %v1186_v61 = vpack.c.bf16 %v1142_v57, %v1142_v57  ;;  %v1187_v62 = vpack.c.bf16 %v1149_v37, %v1149_v37 }
 0x118   : > { %v1205_v63 = vunpack.c.l.b16 %v1186_v61  ;;  %v1206_v0 = vunpack.c.l.b16 %v1187_v62 }
 0x11a   : > { %v1214_v2 = vsel %vm1213_vm4, %v1205_v63, %v1212_v51  ;;  %v1672_v63 = vld [vmem:[%s2202_s12] ss:$0 sm:$0xff] }
 0x11b   : > { %1769 = vmatmul.mubr.msk.bf16.gmra.mrb[12].mxu0 %vm882_vm1, %v1382_v23  ;;  %v1216_v40 = vsel %vm1215_vm5, %v1206_v0, %v1214_v2 }
 0x11c   : > { %v1218_v9 = vsel %vm1217_vm6, %v1207_v26, %v1216_v40 }
 0x11d   : > { %v1220_v16 = vsel %vm1219_vm7, %v1208_v3, %v1218_v9 }
 0x11e   : > { %v1222_v17 = vsel %vm1221_vm8, %v1209_v6, %v1220_v16 }
 0x11f   : > { %v1224_v7 = vsel %vm1223_vm9, %v1210_v14, %v1222_v17 }
 0x120   : > { %v1225_v23 = vpack.c.b16 %v1224_v7, %v1224_v7 }
 0x122   : > { %1751 = vmatmul.mubr.msk.bf16.vlgmr.msra.gmra.mrb[8].mxu1 %vm882_vm1, %v1225_v23 }
 0x123   : > { %1755 = vmatpush3.bf16.msra.mxu1 %v1182_v59  ;;  %1758 = vmatprep.mubr.msk.bf16.mxu1 %vm1834_vm0, %v1833_v4 }
 0x124   : > { %1756 = vmatprep.subr.bf16.mxu1 %v1833_v4 }
 0x127   : > { %1757 = vmatpush3.bf16.msra.mxu1 %v1183_v18 }
 0x12a   : > { %1759 = vmatmul.mubr.msk.bf16.vlgmr.msra.gmra.mrb[12].mxu1 %vm765_vm2, %v2006_v27 }
 0x1e6   : > { %v1766_v21 = vpop.f32.mrb[8].mxu0 }
 0x1e7   : > { %v1448_v22 = vadd.f32 %v1766_v21, %v1673_v19  ;;  %v1439_v24 = vpop.f32.mrb[9].mxu0 }
 0x1e8   : > { %v1440_v10 = vadd.f32 %v1673_v19, %v1439_v24  ;;  %v1767_v8 = vpop.f32.mrb[10].mxu0 }
 0x1e9   : > { %1473 = vst.msk [vmem:[%s626_s1 + $0x10] sm:$0xff] %vm1470_vm10, %v1448_v22  ;;  %v1451_v4 = vadd.f32 %v1767_v8, %v1673_v19  ;;  %v1442_v34 = vpop.f32.mrb[11].mxu0 }
 0x1ea   : > { %1471 = vst.msk [vmem:[%s626_s1] sm:$0xff] %vm1470_vm10, %v1440_v10  ;;  %v1443_v27 = vadd.f32 %v1673_v19, %v1442_v34 }
 0x1eb   : > { %1474 = vst.msk [vmem:[%s626_s1 + $0x18] sm:$0xff] %vm1470_vm10, %v1451_v4 }
 0x1ec   : > { %1472 = vst.msk [vmem:[%s626_s1 + $0x8] sm:$0xff] %vm1470_vm10, %v1443_v27 }
 0x1ee   : > { %v1770_v29 = vpop.f32.mrb[12].mxu0 }
 0x1ef   : > { %v1464_v15 = vadd.f32 %v1770_v29, %v1673_v19  ;;  %v1455_v30 = vpop.f32.mrb[13].mxu0 }
 0x1f0   : > { %v1456_v32 = vadd.f32 %v1673_v19, %v1455_v30  ;;  %v1771_v31 = vpop.f32.mrb[14].mxu0 }
 0x1f1   : > { %1477 = vst.msk [vmem:[%s626_s1 + $0x30] sm:$0xff] %vm1470_vm10, %v1464_v15  ;;  %v1467_v33 = vadd.f32 %v1771_v31, %v1673_v19  ;;  %v1458_v13 = vpop.f32.mrb[15].mxu0 }
 0x1f2   : > { %1475 = vst.msk [vmem:[%s626_s1 + $0x20] sm:$0xff] %vm1470_vm10, %v1456_v32  ;;  %v1459_v36 = vadd.f32 %v1673_v19, %v1458_v13 }
 0x1f3   : > { %1478 = vst.msk [vmem:[%s626_s1 + $0x38] sm:$0xff] %vm1470_vm10, %v1467_v33 }
 0x1f4   : > { %1476 = vst.msk [vmem:[%s626_s1 + $0x28] sm:$0xff] %vm1470_vm10, %v1459_v36 }
 0x1f5   : > { %v1263_v35 = vpop.f32.mrb[8].mxu1 }
 0x1f6   : > { %v1752_v39 = vpop.f32.mrb[9].mxu1 }
 0x1f7   : > { %v1266_v5 = vpop.f32.mrb[10].mxu1 }
 0x1f8   : > { %v1753_v42 = vpop.f32.mrb[11].mxu1 }
 0x1fd   : > { %v1303_v43 = vpop.f32.mrb[12].mxu1 }
 0x1fe   : > { %v1304_v44 = vadd.f32 %v1303_v43, %v1263_v35  ;;  %v1760_v45 = vpop.f32.mrb[13].mxu1 }
 0x1ff   : > { %v1306_v46 = vpop.f32.mrb[14].mxu1 }
 0x200   : > { %v1316_v47 = vadd.f32 %v1670_v28, %v1304_v44  ;;  %v1761_v48 = vpop.f32.mrb[15].mxu1 }
 0x202   : > { %v1317_v49 = vmax.f32 %v1316_v47, 0.0 }
 0x204   : > { %v1322_v51 = vmul.f32 %v1320_v50, %v1317_v49 }
 0x206   : > { %v1323_v53 = vadd.f32 %v1322_v51, %v1987_v20  ;;  %v1671_v20 = vld [vmem:[%s2201_s11] ss:$0 sm:$0xff] }
 0x208   : > { %v1324_v54 = vsel %vm765_vm2, %v1323_v53, 0.0 }
 0x209   : > { %1325 = vadd.xlane.f32.xlu1 %v1324_v54 }
 0x296   : > { %v1326_v55 = vpop.xlane.xlu1 %1325 }
 0x297   : > { %v1328_v56 = vmul.f32 0.03125, %v1326_v55 }
 0x299   : > { %v1329_v57 = vsub.f32 %v1323_v53, %v1328_v56 }
 0x29b   : > { %v1330_v37 = vmul.f32 %v1329_v57, %v1329_v57 }
 0x29d   : > { %v1331_v58 = vsel %vm765_vm2, %v1330_v37, 0.0 }
 0x29e   : > { %1332 = vadd.xlane.f32.xlu0 %v1331_v58 }
 0x32b   : > { %v1333_v60 = vpop.xlane.xlu0 %1332 }
 0x32c   : > { %v1334_v61 = vmul.f32 0.03125, %v1333_v60 }
 0x32e   : > { %v1335_v62 = vadd.f32 1e-05, %v1334_v61 }
 0x330   : > { %1807 = vrsqrt.f32 %v1335_v62 }
 0x33a   : > { %v1808_v52 = vpop.eup %1807 }
 0x33b   : > { %v1337_v38 = vmul.f32 %v1808_v52, %v1329_v57 }
 0x33d   : > { %v1345_v0 = vmul.f32 %v1671_v20, %v1337_v38 }
 0x33f   : > { %v1353_v1 = vadd.f32 %v1672_v63, %v1345_v0 }
 0x341   : > { %1354 = vst.msk [vmem:[%s617_s29] sm:$0xff] %vm765_vm2, %v1353_v1 }
 0x342 PF: > { %s27_s23 = sadd.s32 1, %s1831_s23   ;;  %s2215_s21 = smov %s1827_s22 }
 0x343   : > { %p24_p5 = scmp.ge.s32.totalorder %s27_s23, 4   ;;  %s2216_s22 = smov %s2218_s24 }
 0x345   :  { %26 = sbr.rel (!%p24_p5) target bundleno = 5 (0x5), region = 133 }

// kernel: dense_gnn2_forward.11
= control target key start
LH: loop header
LB: loop body
LE: loop exit
PB: predicated region body
PF: predicated region fallthrough
CT: control target
= control target key end

     0   :  { %v177_v0 = vmov 0.0   ;;  %vm178_vm0 = vmmov 0   ;;  %vm37_vm1 = vcmask 261120   ;;  %vm142_vm2 = vcmask 31744   ;;  %s253_s1 = inlined_call_operand.vmem [shape: f32[32,32], index: 1, kind: input, shape index: {}]   ;;  %s254_s0 = inlined_call_operand.vmem [shape: f32[16,32], index: 0, kind: input, shape index: {}]   ;;  %s255_s3 = inlined_call_operand.vmem [shape: f32[32,4], index: 3, kind: input, shape index: {}]   ;;  %s256_s2 = inlined_call_operand.vmem [shape: f32[1,32], index: 2, kind: input, shape index: {}]   ;;  %s257_s4 = inlined_call_operand.vmem [shape: f32[1,4], index: 4, kind: input, shape index: {}]   ;;  %s258_s5 = inlined_call_operand.vmem [shape: f32[16,4], index: 5, kind: output, shape index: {}]  }
   0x1   :  { %159 = vmatprep.subr.bf16.mxu0 %v177_v0  ;;  %v24_v1 = vld [vmem:[%s253_s1] sm:$0xff]  ;;  %v25_v2 = vld [vmem:[%s253_s1 + $0x8] sm:$0xff]  ;;  %v26_v3 = vld [vmem:[%s253_s1 + $0x10] sm:$0xff]  ;;  %163 = vmatprep.mubr.msk.bf16.mxu0 %vm178_vm0, %v177_v0 }
   0x2   :  { %v28_v4 = vpack.c.bf16 %v25_v2, %v24_v1  ;;  %v27_v5 = vld [vmem:[%s253_s1 + $0x18] sm:$0xff]  ;;  %167 = vmatprep.subr.bf16.mxu1 %v177_v0  ;;  %171 = vmatprep.mubr.msk.bf16.mxu1 %vm178_vm0, %v177_v0  ;;  %v21_v7 = vld [vmem:[%s254_s0] sm:$0xff]  ;;  %v22_v8 = vld [vmem:[%s254_s0 + $0x8] sm:$0xff] }
   0x3   :  { %v29_v6 = vpack.c.bf16 %v27_v5, %v26_v3  ;;  %v23_v9 = vpack.c.bf16 %v22_v8, %v21_v7  ;;  %v85_v10 = vld [vmem:[%s255_s3] sm:$0xff]  ;;  %v86_v11 = vld [vmem:[%s255_s3 + $0x8] sm:$0xff]  ;;  %v87_v13 = vld [vmem:[%s255_s3 + $0x10] sm:$0xff] }
   0x4   :  { %160 = vmatpush3.bf16.msra.mxu0 %v28_v4  ;;  %v89_v12 = vpack.c.bf16 %v86_v11, %v85_v10  ;;  %v88_v14 = vld [vmem:[%s255_s3 + $0x18] sm:$0xff]  ;;  %v149_v16 = vld [vmem:[%s256_s2] ss:$0 sm:$0xff] }
   0x5   :  { %161 = vmatprep.subr.bf16.mxu0 %v177_v0  ;;  %v90_v15 = vpack.c.bf16 %v88_v14, %v87_v13  ;;  %v151_v26 = vld [vmem:[%s257_s4] ss:$0 sm:$0xff] }
   0x6   :  { %168 = vmatpush3.bf16.msra.mxu1 %v89_v12 }
   0x7   :  { %169 = vmatprep.subr.bf16.mxu1 %v177_v0 }
   0x8   :  { %162 = vmatpush3.bf16.msra.mxu0 %v29_v6 }
   0xa   :  { %170 = vmatpush3.bf16.msra.mxu1 %v90_v15 }
   0xb   :  { %164 = vmatmul.mubr.msk.bf16.vlgmr.msra.gmra.mrb[0].mxu0 %vm37_vm1, %v23_v9 }
  0xde   :  { %v75_v17 = vpop.f32.mrb[0].mxu0 }
  0xdf   :  { %v76_v18 = vadd.f32 %v149_v16, %v75_v17  ;;  %v165_v19 = vpop.f32.mrb[1].mxu0 }
  0xe0   :  { %v78_v20 = vpop.f32.mrb[2].mxu0 }
  0xe1   :  { %v79_v21 = vadd.f32 %v149_v16, %v78_v20  ;;  %v166_v22 = vpop.f32.mrb[3].mxu0  ;;  %v82_v23 = vmax.f32 %v76_v18, 0.0 }
  0xe3   :  { %v83_v24 = vmax.f32 %v79_v21, 0.0 }
  0xe5   :  { %v84_v25 = vpack.c.bf16 %v83_v24, %v82_v23 }
  0xe7   :  { %172 = vmatmul.mubr.msk.bf16.vlgmr.msra.gmra.mrb[0].mxu1 %vm37_vm1, %v84_v25 }
 0x1ba   :  { %v135_v27 = vpop.f32.mrb[0].mxu1 }
 0x1bb   :  { %v136_v28 = vadd.f32 %v151_v26, %v135_v27  ;;  %v173_v29 = vpop.f32.mrb[1].mxu1 }
 0x1bc   :  { %v138_v30 = vpop.f32.mrb[2].mxu1 }
 0x1bd   :  { %143 = vst.msk [vmem:[%s258_s5] sm:$0xff] %vm142_vm2, %v136_v28  ;;  %v139_v31 = vadd.f32 %v151_v26, %v138_v30  ;;  %v174_v32 = vpop.f32.mrb[3].mxu1 }
 0x1bf   :  { %144 = vst.msk [vmem:[%s258_s5 + $0x8] sm:$0xff] %vm142_vm2, %v139_v31 }

</bundles_post_ra>
